<compile_context>
chip_gen: v5e
topology: v5e:2x2
jax: 0.10.0
libtpu: 0.0.40
codegen_flags: <defaults>
</compile_context>

<pallas_src>
import math

import jax
import jax.numpy as jnp
from jax import lax
from jax.experimental import pallas as pl
from jax.experimental.pallas import tpu as pltpu

RANDOM_CONFIGS = 3
SPECULAR_CONFIGS = 6
NUM_CONFIGS = RANDOM_CONFIGS + SPECULAR_CONFIGS
EPS_RENDER = 0.1
_MIN_DOT = 1e-3
_INV_PI = 1.0 / math.pi

# geometry scratch plane indices (per config)
_G_WOX, _G_WOY, _G_WOZ = 0, 1, 2
_G_WIX, _G_WIY, _G_WIZ = 3, 4, 5
_G_HX, _G_HY, _G_HZ = 6, 7, 8
_G_INVD2, _G_OMVH5 = 9, 10
_N_GEOM = 11

# prep scratch plane indices (per svbrdf slot: 0=input, 1=target)
#   0..2  normalized normal, 3..5 alpha^2 per channel,
#   6..8  F0 (specular albedo), 9..11 diffuse*(1-F0)/pi
_N_PREP = 12


# ----------------------------------------------------------------------------
# Scene generation (deterministic, jax.random)
# ----------------------------------------------------------------------------
def _random_hemisphere_dir(key, count, min_eps=0.001, max_eps=0.05):
    k1, k2 = jax.random.split(key)
    r1 = jax.random.uniform(k1, (count, 1), minval=min_eps, maxval=1.0 - max_eps)
    r2 = jax.random.uniform(k2, (count, 1))
    r = jnp.sqrt(r1)
    phi = 2.0 * jnp.pi * r2
    x = r * jnp.cos(phi)
    y = r * jnp.sin(phi)
    z = jnp.sqrt(1.0 - r * r)
    return jnp.concatenate([x, y, z], axis=-1)


def generate_random_scenes(key, count):
    kv, kl = jax.random.split(key)
    views = _random_hemisphere_dir(kv, count)
    lights = _random_hemisphere_dir(kl, count) * 2.197
    intens = jnp.full((count, 3), 20.0, jnp.float32)
    return views, lights, intens


def generate_specular_scenes(key, count):
    k1, k2, k3, k4 = jax.random.split(key, 4)
    view_dirs = _random_hemisphere_dir(k1, count)
    light_dirs = view_dirs * jnp.array([[-1.0, -1.0, 1.0]], jnp.float32)
    dist_view = jnp.exp(jax.random.normal(k2, (count, 1)) * 0.75 + 0.5)
    dist_light = jnp.exp(jax.random.normal(k3, (count, 1)) * 0.75 + 0.5)
    shift = jnp.concatenate(
        [jax.random.uniform(k4, (count, 2), minval=-1.0, maxval=1.0),
         jnp.full((count, 1), 1e-4, jnp.float32)], axis=-1)
    views = view_dirs * dist_view + shift
    lights = light_dirs * dist_light + shift
    intens = jnp.full((count, 3), 20.0, jnp.float32)
    return views, lights, intens


def _build_scene_configs(key):
    kr, ks = jax.random.split(key)
    vr, lr, ir_ = generate_random_scenes(kr, RANDOM_CONFIGS)
    vs, ls, is_ = generate_specular_scenes(ks, SPECULAR_CONFIGS)
    views = jnp.concatenate([vr, vs], axis=0)
    lights = jnp.concatenate([lr, ls], axis=0)
    intens = jnp.concatenate([ir_, is_], axis=0)
    # [9, 9]: cols 0-2 view pos, 3-5 light pos, 6-8 light color intensity
    return jnp.concatenate([views, lights, intens], axis=-1).astype(jnp.float32)


def _build_coords(H, W):
    xr = jnp.linspace(-1.0, 1.0, W, dtype=jnp.float32)
    yr = -jnp.linspace(-1.0, 1.0, H, dtype=jnp.float32)
    xc = jnp.broadcast_to(xr[None, :], (H, W)).reshape(-1)
    yc = jnp.broadcast_to(yr[:, None], (H, W)).reshape(-1)
    return jnp.stack([xc, yc], axis=0)  # [2, P], surface z == 0


# ----------------------------------------------------------------------------
# Pallas kernel
# ----------------------------------------------------------------------------
def _rendering_loss_kernel(scenes_ref, coords_ref, in_ref, tgt_ref, out_ref,
                           geom_ref, prep_ref, acc_ref):
    b = pl.program_id(1)

    # ---- per-tile geometry: compute once (b == 0), reuse for all batches ---
    @pl.when(b == 0)
    def _():
        px = coords_ref[0]                 # (R, 128)
        py = coords_ref[1]                 # (R, 128)

        @pl.loop(0, NUM_CONFIGS)
        def _(c):
            base = c * 9
            vx = scenes_ref[base + 0]
            vy = scenes_ref[base + 1]
            vz = scenes_ref[base + 2]
            lx = scenes_ref[base + 3]
            ly = scenes_ref[base + 4]
            lz = scenes_ref[base + 5]

            wox_u = vx - px
            woy_u = vy - py
            wo_inv = lax.rsqrt(jnp.maximum(
                wox_u * wox_u + woy_u * woy_u + vz * vz, 1e-12))
            wox, woy, woz = wox_u * wo_inv, woy_u * wo_inv, vz * wo_inv

            wix_u = lx - px
            wiy_u = ly - py
            wi_inv = lax.rsqrt(jnp.maximum(
                wix_u * wix_u + wiy_u * wiy_u + lz * lz, 1e-12))
            inv_dist2 = wi_inv * wi_inv
            wix, wiy, wiz = wix_u * wi_inv, wiy_u * wi_inv, lz * wi_inv

            hx_u = wix + wox
            hy_u = wiy + woy
            hz_u = wiz + woz
            h_inv = lax.rsqrt(jnp.maximum(
                hx_u * hx_u + hy_u * hy_u + hz_u * hz_u, 1e-12))
            hx, hy, hz = hx_u * h_inv, hy_u * h_inv, hz_u * h_inv

            VH = jnp.maximum(wox * hx + woy * hy + woz * hz, _MIN_DOT)
            omvh = 1.0 - VH
            omvh2 = omvh * omvh
            omvh5 = omvh2 * omvh2 * omvh

            geom_ref[c, _G_WOX] = wox
            geom_ref[c, _G_WOY] = woy
            geom_ref[c, _G_WOZ] = woz
            geom_ref[c, _G_WIX] = wix
            geom_ref[c, _G_WIY] = wiy
            geom_ref[c, _G_WIZ] = wiz
            geom_ref[c, _G_HX] = hx
            geom_ref[c, _G_HY] = hy
            geom_ref[c, _G_HZ] = hz
            geom_ref[c, _G_INVD2] = inv_dist2
            geom_ref[c, _G_OMVH5] = omvh5

    # ---- SVBRDF prep (config-invariant), staged into VMEM scratch ----------
    def prep(sv_ref, slot):
        nx = sv_ref[0, 0] * 2.0 - 1.0
        ny = sv_ref[0, 1] * 2.0 - 1.0
        nz = sv_ref[0, 2] * 2.0 - 1.0
        n_inv = lax.rsqrt(jnp.maximum(nx * nx + ny * ny + nz * nz, 1e-12))
        prep_ref[slot, 0] = nx * n_inv
        prep_ref[slot, 1] = ny * n_inv
        prep_ref[slot, 2] = nz * n_inv
        for ch in range(3):
            diff = sv_ref[0, 3 + ch]
            rough = jnp.clip(sv_ref[0, 6 + ch], 0.001, 1.0)
            spec = sv_ref[0, 9 + ch]
            alpha = rough * rough
            prep_ref[slot, 3 + ch] = alpha * alpha               # alpha^2
            prep_ref[slot, 6 + ch] = spec                        # F0
            prep_ref[slot, 9 + ch] = diff * (1.0 - spec) * _INV_PI

    prep(in_ref, 0)
    prep(tgt_ref, 1)

    acc_ref[...] = jnp.zeros_like(acc_ref)

    # ---- rolled config loop: bounded live ranges, scalars from SMEM --------
    @pl.loop(0, NUM_CONFIGS)
    def _(c):
        base = c * 9
        intens = (scenes_ref[base + 6], scenes_ref[base + 7],
                  scenes_ref[base + 8])

        wox = geom_ref[c, _G_WOX]
        woy = geom_ref[c, _G_WOY]
        woz = geom_ref[c, _G_WOZ]
        wix = geom_ref[c, _G_WIX]
        wiy = geom_ref[c, _G_WIY]
        wiz = geom_ref[c, _G_WIZ]
        hx = geom_ref[c, _G_HX]
        hy = geom_ref[c, _G_HY]
        hz = geom_ref[c, _G_HZ]
        inv_dist2 = geom_ref[c, _G_INVD2]
        omvh5 = geom_ref[c, _G_OMVH5]
        one_m_omvh5 = 1.0 - omvh5

        def dots(slot):
            nx = prep_ref[slot, 0]
            ny = prep_ref[slot, 1]
            nz = prep_ref[slot, 2]
            NH = jnp.maximum(nx * hx + ny * hy + nz * hz, _MIN_DOT)
            VN = jnp.maximum(wox * nx + woy * ny + woz * nz, _MIN_DOT)
            LN_raw = wix * nx + wiy * ny + wiz * nz
            LN = jnp.maximum(LN_raw, _MIN_DOT)
            shared = jnp.maximum(LN_raw, 0.0) * inv_dist2        # cos / d^2
            return NH * NH, VN, VN * VN, LN, LN * LN, shared

        d_in = dots(0)
        d_tg = dots(1)

        def radiance(slot, ch, d):
            nh2, VN, vn2, LN, ln2, shared = d
            alpha2 = prep_ref[slot, 3 + ch]
            spec = prep_ref[slot, 6 + ch]
            diff_base = prep_ref[slot, 9 + ch]
            a2m1 = alpha2 - 1.0
            denom = jnp.maximum(nh2 * a2m1 + 1.0, 1e-3)
            # Smith G1 folded with 1/(4 VN LN):
            #   G1(x) = 2 x / (x + sqrt(alpha2 + (1-alpha2) x^2))
            sA = jnp.sqrt(alpha2 - a2m1 * vn2)
            sB = jnp.sqrt(alpha2 - a2m1 * ln2)
            F = omvh5 + spec * one_m_omvh5                       # Schlick
            inv = pl.reciprocal(
                denom * denom * (VN + sA) * (LN + sB), approx=True)
            return (diff_base + F * alpha2 * _INV_PI * inv) * shared

        acc = acc_ref[...]
        for ch in range(3):
            a = radiance(0, ch, d_in) * intens[ch] + EPS_RENDER
            t = radiance(1, ch, d_tg) * intens[ch] + EPS_RENDER
            acc = acc + jnp.abs(jnp.log(a) - jnp.log(t))         # exact logs
        acc_ref[...] = acc

    # One cross-lane reduce per grid step; keep the stored block (8,128)-dense.
    out_ref[...] = jnp.broadcast_to(jnp.sum(acc_ref[...]), out_ref.shape)


def _pick_tile_rows(total_rows, max_rows=32):
    """Tile height in sublane rows of 128 px.  32 rows (4096 px) amortizes the
    ~0.35 us per-grid-step overhead while keeping vreg pressure + VMEM small
    (safe for v5e's single vst slot / 16 MiB scoped VMEM and v7x's 64 MiB)."""
    if total_rows <= max_rows:
        return total_rows
    r = max_rows - (max_rows % 8)
    while r >= 8:
        if total_rows % r == 0:
            return r
        r -= 8
    return total_rows


def rendering_loss(input_svbrdf, target_svbrdf, scene_key, *, tile_rows=None):
    B, C, H, W = input_svbrdf.shape
    assert C == 12, "expect stacked SVBRDF channels: normals|diffuse|rough|spec"
    P = H * W
    assert P % 128 == 0, "H*W must be a multiple of 128 for lane tiling"
    total_rows = P // 128
    R = _pick_tile_rows(total_rows) if tile_rows is None else tile_rows
    assert total_rows % R == 0
    num_tiles = total_rows // R

    scenes = _build_scene_configs(scene_key).reshape(-1)          # (81,)
    coords = _build_coords(H, W).reshape(2, total_rows, 128)      # (2, rows, 128)
    sv_in = input_svbrdf.reshape(B, 12, total_rows, 128).astype(jnp.float32)
    sv_tg = target_svbrdf.reshape(B, 12, total_rows, 128).astype(jnp.float32)

    # Grid: tiles (parallel, shardable across v7x's 2 TCs) x batch (arbitrary,
    # innermost so per-tile geometry in scratch is reused across the batch).
    partials = pl.pallas_call(
        _rendering_loss_kernel,
        out_shape=jax.ShapeDtypeStruct((num_tiles, B, 8, 128), jnp.float32),
        grid_spec=pltpu.PrefetchScalarGridSpec(
            num_scalar_prefetch=0,
            grid=(num_tiles, B),
            in_specs=[
                pl.BlockSpec(memory_space=pltpu.MemorySpace.SMEM),          # scenes
                pl.BlockSpec((2, R, 128), lambda t, b: (0, t, 0)),          # coords
                pl.BlockSpec((1, 12, R, 128), lambda t, b: (b, 0, t, 0)),   # input
                pl.BlockSpec((1, 12, R, 128), lambda t, b: (b, 0, t, 0)),   # target
            ],
            out_specs=pl.BlockSpec((1, 1, 8, 128), lambda t, b: (t, b, 0, 0)),
            scratch_shapes=[
                pltpu.VMEM((NUM_CONFIGS, _N_GEOM, R, 128), jnp.float32),  # geometry
                pltpu.VMEM((2, _N_PREP, R, 128), jnp.float32),            # prep
                pltpu.VMEM((R, 128), jnp.float32),                        # accumulator
            ]),
        compiler_params=pltpu.CompilerParams(
            dimension_semantics=("parallel", "arbitrary")),
    )(scenes, coords, sv_in, sv_tg)

    # torch.nn.functional.l1_loss 'mean' denominator: B * 9 configs * 3 ch * P
    n_total = float(B * NUM_CONFIGS * 3 * P)
    return jnp.sum(partials[:, :, 0, 0]) / n_total


# ----------------------------------------------------------------------------
# Pure-JAX reference (original un-folded math) for correctness checking
# ----------------------------------------------------------------------------
def _g1_ref(alpha2, xn):
    xn2 = xn * xn
    return 2.0 / (1.0 + jnp.sqrt(1.0 + alpha2 * (1.0 - xn2) / xn2))


def _render_config_ref(sv, coords, cfg):
    """sv: [12,P]  coords: [2,P]  cfg: 9 scalars -> list of 3 rows [1,P]."""
    vx, vy, vz, lx, ly, lz, ir, ig, ib = cfg
    px = coords[0:1, :]
    py = coords[1:2, :]

    nx = sv[0:1, :] * 2.0 - 1.0
    ny = sv[1:2, :] * 2.0 - 1.0
    nz = sv[2:3, :] * 2.0 - 1.0
    n_inv = lax.rsqrt(jnp.maximum(nx * nx + ny * ny + nz * nz, 1e-12))
    nx, ny, nz = nx * n_inv, ny * n_inv, nz * n_inv

    wox_u, woy_u, woz_u = vx - px, vy - py, vz - 0.0
    wo_inv = lax.rsqrt(wox_u * wox_u + woy_u * woy_u + woz_u * woz_u)
    wox, woy, woz = wox_u * wo_inv, woy_u * wo_inv, woz_u * wo_inv

    wix_u, wiy_u, wiz_u = lx - px, ly - py, lz - 0.0
    dist2 = wix_u * wix_u + wiy_u * wiy_u + wiz_u * wiz_u
    wi_inv = lax.rsqrt(dist2)
    wix, wiy, wiz = wix_u * wi_inv, wiy_u * wi_inv, wiz_u * wi_inv

    hx_u, hy_u, hz_u = wix + wox, wiy + woy, wiz + woz
    h_inv = lax.rsqrt(jnp.maximum(hx_u * hx_u + hy_u * hy_u + hz_u * hz_u, 1e-12))
    hx, hy, hz = hx_u * h_inv, hy_u * h_inv, hz_u * h_inv

    NH = jnp.maximum(nx * hx + ny * hy + nz * hz, _MIN_DOT)
    VH = jnp.maximum(wox * hx + woy * hy + woz * hz, _MIN_DOT)
    VN = jnp.maximum(wox * nx + woy * ny + woz * nz, _MIN_DOT)
    LN_raw = wix * nx + wiy * ny + wiz * nz
    LN = jnp.maximum(LN_raw, _MIN_DOT)

    omvh = 1.0 - VH
    omvh2 = omvh * omvh
    omvh5 = omvh2 * omvh2 * omvh
    nh2 = NH * NH

    shared = jnp.maximum(LN_raw, 0.0) / dist2
    intens = (ir, ig, ib)

    rads = []
    for ch in range(3):
        diff = sv[3 + ch:4 + ch, :]
        rough = jnp.clip(sv[6 + ch:7 + ch, :], 0.001, 1.0)
        spec = sv[9 + ch:10 + ch, :]

        alpha = rough * rough
        alpha2 = alpha * alpha
        denom = jnp.maximum(nh2 * (alpha2 - 1.0) + 1.0, 1e-3)
        D = alpha2 / (math.pi * denom * denom)
        F = spec + (1.0 - spec) * omvh5
        G = _g1_ref(alpha2, VN) * _g1_ref(alpha2, LN)

        spec_term = F * G * D / (4.0 * VN * LN)
        diff_term = diff * (1.0 - spec) / math.pi
        rads.append((diff_term + spec_term) * shared * intens[ch])
    return rads


def rendering_loss_reference(input_svbrdf, target_svbrdf, scene_key):
    B, C, H, W = input_svbrdf.shape
    P = H * W
    scenes = _build_scene_configs(scene_key)
    coords = _build_coords(H, W)
    sv_in = input_svbrdf.reshape(B, 12, P).astype(jnp.float32)
    sv_tg = target_svbrdf.reshape(B, 12, P).astype(jnp.float32)

    total = jnp.zeros((), jnp.float32)
    for b in range(B):
        for c in range(NUM_CONFIGS):
            cfg = tuple(scenes[c, j] for j in range(9))
            rin = _render_config_ref(sv_in[b], coords, cfg)
            rtg = _render_config_ref(sv_tg[b], coords, cfg)
            for a, t in zip(rin, rtg):
                total += jnp.sum(
                    jnp.abs(jnp.log(a + EPS_RENDER) - jnp.log(t + EPS_RENDER)))
    return total / (B * NUM_CONFIGS * 3 * P)


if __name__ == "__main__":
    key = jax.random.PRNGKey(0)
    k_in, k_tgt, k_scene = jax.random.split(key, 3)

    B, C, H, W = 2, 12, 16, 16
    input_svbrdf = jax.random.uniform(k_in, (B, C, H, W), jnp.float32)
    target_svbrdf = jax.random.uniform(k_tgt, (B, C, H, W), jnp.float32)

    loss = rendering_loss(input_svbrdf, target_svbrdf, k_scene)
    loss = jax.block_until_ready(loss)

    loss_ref = jax.block_until_ready(
        rendering_loss_reference(input_svbrdf, target_svbrdf, k_scene))

    assert jnp.isfinite(loss), "kernel produced non-finite loss"
    # Tolerance covers the ~2^-12 relative error introduced by the EUP
    # approximate reciprocal on the specular denominator (log-diff is exact).
    assert abs(float(loss) - float(loss_ref)) <= 2e-3 * max(1.0, abs(float(loss_ref))), \
        (float(loss), float(loss_ref))
    print("KERNEL_OK")
</pallas_src>

<mosaic_0001>
module attributes {stable_mosaic.version = 11 : i64} {
  func.func @_rendering_loss_kernel(%arg0: i32, %arg1: i32, %arg2: memref<81xf32, #tpu.memory_space<smem>>, %arg3: memref<2x2x128xf32, #tpu.memory_space<vmem>>, %arg4: memref<1x12x2x128xf32, #tpu.memory_space<vmem>>, %arg5: memref<1x12x2x128xf32, #tpu.memory_space<vmem>>, %arg6: memref<1x1x8x128xf32, #tpu.memory_space<vmem>>, %arg7: memref<9x11x2x128xf32, #tpu.memory_space<vmem>>, %arg8: memref<2x12x2x128xf32, #tpu.memory_space<vmem>>, %arg9: memref<2x128xf32, #tpu.memory_space<vmem>>) attributes {dimension_semantics = [#tpu.dimension_semantics<parallel>, #tpu.dimension_semantics<arbitrary>], iteration_bounds = array<i64: 1, 2>, scalar_prefetch = 0 : i64, scratch_operands = 3 : i64, tpu.core_type = #tpu.core_type<tc>, window_params = [{transform_indices = @transform_0, window_bounds = array<i64: 81>}, {transform_indices = @transform_1, window_bounds = array<i64: 2, 2, 128>}, {transform_indices = @transform_2, window_bounds = array<i64: 1, 12, 2, 128>}, {transform_indices = @transform_3, window_bounds = array<i64: 1, 12, 2, 128>}, {transform_indices = @transform_4, window_bounds = array<i64: 1, 1, 8, 128>}]} {
    %c0_i32 = arith.constant 0 : i32
    %0 = arith.cmpi eq, %arg1, %c0_i32 : i32
    %1 = arith.extui %0 : i1 to i32
    %c0_i32_0 = arith.constant 0 : i32
    %2 = arith.cmpi ne, %1, %c0_i32_0 : i32
    scf.if %2 {
      %c0_230 = arith.constant 0 : index
      %c0_231 = arith.constant 0 : index
      %c0_232 = arith.constant 0 : index
      %245 = vector.load %arg3[%c0_230, %c0_231, %c0_232] : memref<2x2x128xf32, #tpu.memory_space<vmem>>, vector<1x2x128xf32>
      %246 = vector.shape_cast %245 : vector<1x2x128xf32> to vector<2x128xf32>
      %c1_233 = arith.constant 1 : index
      %c0_234 = arith.constant 0 : index
      %c0_235 = arith.constant 0 : index
      %247 = vector.load %arg3[%c1_233, %c0_234, %c0_235] : memref<2x2x128xf32, #tpu.memory_space<vmem>>, vector<1x2x128xf32>
      %248 = vector.shape_cast %247 : vector<1x2x128xf32> to vector<2x128xf32>
      %c0_i32_236 = arith.constant 0 : i32
      %c9_i32_237 = arith.constant 9 : i32
      %249 = arith.addi %c0_i32_236, %c9_i32_237 : i32
      %c1_i32_238 = arith.constant 1 : i32
      scf.for %arg10 = %c0_i32_236 to %249 step %c1_i32_238  : i32 {
        %c1_i32_240 = arith.constant 1 : i32
        %250 = arith.muli %arg10, %c1_i32_240 : i32
        %c0_i32_241 = arith.constant 0 : i32
        %251 = arith.addi %c0_i32_241, %250 : i32
        %c9_i32_242 = arith.constant 9 : i32
        %252 = arith.muli %251, %c9_i32_242 : i32
        %c0_i32_243 = arith.constant 0 : i32
        %253 = arith.addi %252, %c0_i32_243 : i32
        %254 = arith.index_cast %253 : i32 to index
        %255 = memref.load %arg2[%254] : memref<81xf32, #tpu.memory_space<smem>>
        %c1_i32_244 = arith.constant 1 : i32
        %256 = arith.addi %252, %c1_i32_244 : i32
        %257 = arith.index_cast %256 : i32 to index
        %258 = memref.load %arg2[%257] : memref<81xf32, #tpu.memory_space<smem>>
        %c2_i32 = arith.constant 2 : i32
        %259 = arith.addi %252, %c2_i32 : i32
        %260 = arith.index_cast %259 : i32 to index
        %261 = memref.load %arg2[%260] : memref<81xf32, #tpu.memory_space<smem>>
        %c3_i32 = arith.constant 3 : i32
        %262 = arith.addi %252, %c3_i32 : i32
        %263 = arith.index_cast %262 : i32 to index
        %264 = memref.load %arg2[%263] : memref<81xf32, #tpu.memory_space<smem>>
        %c4_i32 = arith.constant 4 : i32
        %265 = arith.addi %252, %c4_i32 : i32
        %266 = arith.index_cast %265 : i32 to index
        %267 = memref.load %arg2[%266] : memref<81xf32, #tpu.memory_space<smem>>
        %c5_i32 = arith.constant 5 : i32
        %268 = arith.addi %252, %c5_i32 : i32
        %269 = arith.index_cast %268 : i32 to index
        %270 = memref.load %arg2[%269] : memref<81xf32, #tpu.memory_space<smem>>
        %271 = vector.broadcast %255 : f32 to vector<2x128xf32>
        %272 = arith.subf %271, %246 : vector<2x128xf32>
        %273 = vector.broadcast %258 : f32 to vector<2x128xf32>
        %274 = arith.subf %273, %248 : vector<2x128xf32>
        %275 = arith.mulf %272, %272 : vector<2x128xf32>
        %276 = arith.mulf %274, %274 : vector<2x128xf32>
        %277 = arith.addf %275, %276 : vector<2x128xf32>
        %278 = arith.mulf %261, %261 : f32
        %279 = vector.broadcast %278 : f32 to vector<2x128xf32>
        %280 = arith.addf %277, %279 : vector<2x128xf32>
        %cst_245 = arith.constant 9.99999996E-13 : f32
        %281 = vector.broadcast %cst_245 : f32 to vector<2x128xf32>
        %282 = arith.maximumf %280, %281 : vector<2x128xf32>
        %283 = math.rsqrt %282 : vector<2x128xf32>
        %284 = arith.mulf %272, %283 : vector<2x128xf32>
        %285 = arith.mulf %274, %283 : vector<2x128xf32>
        %286 = vector.broadcast %261 : f32 to vector<2x128xf32>
        %287 = arith.mulf %286, %283 : vector<2x128xf32>
        %288 = vector.broadcast %264 : f32 to vector<2x128xf32>
        %289 = arith.subf %288, %246 : vector<2x128xf32>
        %290 = vector.broadcast %267 : f32 to vector<2x128xf32>
        %291 = arith.subf %290, %248 : vector<2x128xf32>
        %292 = arith.mulf %289, %289 : vector<2x128xf32>
        %293 = arith.mulf %291, %291 : vector<2x128xf32>
        %294 = arith.addf %292, %293 : vector<2x128xf32>
        %295 = arith.mulf %270, %270 : f32
        %296 = vector.broadcast %295 : f32 to vector<2x128xf32>
        %297 = arith.addf %294, %296 : vector<2x128xf32>
        %cst_246 = arith.constant 9.99999996E-13 : f32
        %298 = vector.broadcast %cst_246 : f32 to vector<2x128xf32>
        %299 = arith.maximumf %297, %298 : vector<2x128xf32>
        %300 = math.rsqrt %299 : vector<2x128xf32>
        %301 = arith.mulf %300, %300 : vector<2x128xf32>
        %302 = arith.mulf %289, %300 : vector<2x128xf32>
        %303 = arith.mulf %291, %300 : vector<2x128xf32>
        %304 = vector.broadcast %270 : f32 to vector<2x128xf32>
        %305 = arith.mulf %304, %300 : vector<2x128xf32>
        %306 = arith.addf %302, %284 : vector<2x128xf32>
        %307 = arith.addf %303, %285 : vector<2x128xf32>
        %308 = arith.addf %305, %287 : vector<2x128xf32>
        %309 = arith.mulf %306, %306 : vector<2x128xf32>
        %310 = arith.mulf %307, %307 : vector<2x128xf32>
        %311 = arith.addf %309, %310 : vector<2x128xf32>
        %312 = arith.mulf %308, %308 : vector<2x128xf32>
        %313 = arith.addf %311, %312 : vector<2x128xf32>
        %cst_247 = arith.constant 9.99999996E-13 : f32
        %314 = vector.broadcast %cst_247 : f32 to vector<2x128xf32>
        %315 = arith.maximumf %313, %314 : vector<2x128xf32>
        %316 = math.rsqrt %315 : vector<2x128xf32>
        %317 = arith.mulf %306, %316 : vector<2x128xf32>
        %318 = arith.mulf %307, %316 : vector<2x128xf32>
        %319 = arith.mulf %308, %316 : vector<2x128xf32>
        %320 = arith.mulf %284, %317 : vector<2x128xf32>
        %321 = arith.mulf %285, %318 : vector<2x128xf32>
        %322 = arith.addf %320, %321 : vector<2x128xf32>
        %323 = arith.mulf %287, %319 : vector<2x128xf32>
        %324 = arith.addf %322, %323 : vector<2x128xf32>
        %cst_248 = arith.constant 1.000000e-03 : f32
        %325 = vector.broadcast %cst_248 : f32 to vector<2x128xf32>
        %326 = arith.maximumf %324, %325 : vector<2x128xf32>
        %cst_249 = arith.constant 1.000000e+00 : f32
        %327 = vector.broadcast %cst_249 : f32 to vector<2x128xf32>
        %328 = arith.subf %327, %326 : vector<2x128xf32>
        %329 = arith.mulf %328, %328 : vector<2x128xf32>
        %330 = arith.mulf %329, %329 : vector<2x128xf32>
        %331 = arith.mulf %330, %328 : vector<2x128xf32>
        %332 = arith.index_cast %251 : i32 to index
        %c0_250 = arith.constant 0 : index
        %c0_251 = arith.constant 0 : index
        %c0_252 = arith.constant 0 : index
        %333 = vector.load %arg7[%332, %c0_250, %c0_251, %c0_252] : memref<9x11x2x128xf32, #tpu.memory_space<vmem>>, vector<1x1x2x128xf32>
        %334 = vector.shape_cast %333 : vector<1x1x2x128xf32> to vector<2x128xf32>
        %335 = vector.shape_cast %284 : vector<2x128xf32> to vector<1x1x2x128xf32>
        tpu.vector_store %arg7[%332, %c0_250, %c0_251, %c0_252], %335 {strides = array<i32>} : memref<9x11x2x128xf32, #tpu.memory_space<vmem>>, vector<1x1x2x128xf32>,
        %336 = arith.index_cast %251 : i32 to index
        %c1_253 = arith.constant 1 : index
        %c0_254 = arith.constant 0 : index
        %c0_255 = arith.constant 0 : index
        %337 = vector.load %arg7[%336, %c1_253, %c0_254, %c0_255] : memref<9x11x2x128xf32, #tpu.memory_space<vmem>>, vector<1x1x2x128xf32>
        %338 = vector.shape_cast %337 : vector<1x1x2x128xf32> to vector<2x128xf32>
        %339 = vector.shape_cast %285 : vector<2x128xf32> to vector<1x1x2x128xf32>
        tpu.vector_store %arg7[%336, %c1_253, %c0_254, %c0_255], %339 {strides = array<i32>} : memref<9x11x2x128xf32, #tpu.memory_space<vmem>>, vector<1x1x2x128xf32>,
        %340 = arith.index_cast %251 : i32 to index
        %c2_256 = arith.constant 2 : index
        %c0_257 = arith.constant 0 : index
        %c0_258 = arith.constant 0 : index
        %341 = vector.load %arg7[%340, %c2_256, %c0_257, %c0_258] : memref<9x11x2x128xf32, #tpu.memory_space<vmem>>, vector<1x1x2x128xf32>
        %342 = vector.shape_cast %341 : vector<1x1x2x128xf32> to vector<2x128xf32>
        %343 = vector.shape_cast %287 : vector<2x128xf32> to vector<1x1x2x128xf32>
        tpu.vector_store %arg7[%340, %c2_256, %c0_257, %c0_258], %343 {strides = array<i32>} : memref<9x11x2x128xf32, #tpu.memory_space<vmem>>, vector<1x1x2x128xf32>,
        %344 = arith.index_cast %251 : i32 to index
        %c3_259 = arith.constant 3 : index
        %c0_260 = arith.constant 0 : index
        %c0_261 = arith.constant 0 : index
        %345 = vector.load %arg7[%344, %c3_259, %c0_260, %c0_261] : memref<9x11x2x128xf32, #tpu.memory_space<vmem>>, vector<1x1x2x128xf32>
        %346 = vector.shape_cast %345 : vector<1x1x2x128xf32> to vector<2x128xf32>
        %347 = vector.shape_cast %302 : vector<2x128xf32> to vector<1x1x2x128xf32>
        tpu.vector_store %arg7[%344, %c3_259, %c0_260, %c0_261], %347 {strides = array<i32>} : memref<9x11x2x128xf32, #tpu.memory_space<vmem>>, vector<1x1x2x128xf32>,
        %348 = arith.index_cast %251 : i32 to index
        %c4_262 = arith.constant 4 : index
        %c0_263 = arith.constant 0 : index
        %c0_264 = arith.constant 0 : index
        %349 = vector.load %arg7[%348, %c4_262, %c0_263, %c0_264] : memref<9x11x2x128xf32, #tpu.memory_space<vmem>>, vector<1x1x2x128xf32>
        %350 = vector.shape_cast %349 : vector<1x1x2x128xf32> to vector<2x128xf32>
        %351 = vector.shape_cast %303 : vector<2x128xf32> to vector<1x1x2x128xf32>
        tpu.vector_store %arg7[%348, %c4_262, %c0_263, %c0_264], %351 {strides = array<i32>} : memref<9x11x2x128xf32, #tpu.memory_space<vmem>>, vector<1x1x2x128xf32>,
        %352 = arith.index_cast %251 : i32 to index
        %c5_265 = arith.constant 5 : index
        %c0_266 = arith.constant 0 : index
        %c0_267 = arith.constant 0 : index
        %353 = vector.load %arg7[%352, %c5_265, %c0_266, %c0_267] : memref<9x11x2x128xf32, #tpu.memory_space<vmem>>, vector<1x1x2x128xf32>
        %354 = vector.shape_cast %353 : vector<1x1x2x128xf32> to vector<2x128xf32>
        %355 = vector.shape_cast %305 : vector<2x128xf32> to vector<1x1x2x128xf32>
        tpu.vector_store %arg7[%352, %c5_265, %c0_266, %c0_267], %355 {strides = array<i32>} : memref<9x11x2x128xf32, #tpu.memory_space<vmem>>, vector<1x1x2x128xf32>,
        %356 = arith.index_cast %251 : i32 to index
        %c6_268 = arith.constant 6 : index
        %c0_269 = arith.constant 0 : index
        %c0_270 = arith.constant 0 : index
        %357 = vector.load %arg7[%356, %c6_268, %c0_269, %c0_270] : memref<9x11x2x128xf32, #tpu.memory_space<vmem>>, vector<1x1x2x128xf32>
        %358 = vector.shape_cast %357 : vector<1x1x2x128xf32> to vector<2x128xf32>
        %359 = vector.shape_cast %317 : vector<2x128xf32> to vector<1x1x2x128xf32>
        tpu.vector_store %arg7[%356, %c6_268, %c0_269, %c0_270], %359 {strides = array<i32>} : memref<9x11x2x128xf32, #tpu.memory_space<vmem>>, vector<1x1x2x128xf32>,
        %360 = arith.index_cast %251 : i32 to index
        %c7_271 = arith.constant 7 : index
        %c0_272 = arith.constant 0 : index
        %c0_273 = arith.constant 0 : index
        %361 = vector.load %arg7[%360, %c7_271, %c0_272, %c0_273] : memref<9x11x2x128xf32, #tpu.memory_space<vmem>>, vector<1x1x2x128xf32>
        %362 = vector.shape_cast %361 : vector<1x1x2x128xf32> to vector<2x128xf32>
        %363 = vector.shape_cast %318 : vector<2x128xf32> to vector<1x1x2x128xf32>
        tpu.vector_store %arg7[%360, %c7_271, %c0_272, %c0_273], %363 {strides = array<i32>} : memref<9x11x2x128xf32, #tpu.memory_space<vmem>>, vector<1x1x2x128xf32>,
        %364 = arith.index_cast %251 : i32 to index
        %c8_274 = arith.constant 8 : index
        %c0_275 = arith.constant 0 : index
        %c0_276 = arith.constant 0 : index
        %365 = vector.load %arg7[%364, %c8_274, %c0_275, %c0_276] : memref<9x11x2x128xf32, #tpu.memory_space<vmem>>, vector<1x1x2x128xf32>
        %366 = vector.shape_cast %365 : vector<1x1x2x128xf32> to vector<2x128xf32>
        %367 = vector.shape_cast %319 : vector<2x128xf32> to vector<1x1x2x128xf32>
        tpu.vector_store %arg7[%364, %c8_274, %c0_275, %c0_276], %367 {strides = array<i32>} : memref<9x11x2x128xf32, #tpu.memory_space<vmem>>, vector<1x1x2x128xf32>,
        %368 = arith.index_cast %251 : i32 to index
        %c9_277 = arith.constant 9 : index
        %c0_278 = arith.constant 0 : index
        %c0_279 = arith.constant 0 : index
        %369 = vector.load %arg7[%368, %c9_277, %c0_278, %c0_279] : memref<9x11x2x128xf32, #tpu.memory_space<vmem>>, vector<1x1x2x128xf32>
        %370 = vector.shape_cast %369 : vector<1x1x2x128xf32> to vector<2x128xf32>
        %371 = vector.shape_cast %301 : vector<2x128xf32> to vector<1x1x2x128xf32>
        tpu.vector_store %arg7[%368, %c9_277, %c0_278, %c0_279], %371 {strides = array<i32>} : memref<9x11x2x128xf32, #tpu.memory_space<vmem>>, vector<1x1x2x128xf32>,
        %372 = arith.index_cast %251 : i32 to index
        %c10_280 = arith.constant 10 : index
        %c0_281 = arith.constant 0 : index
        %c0_282 = arith.constant 0 : index
        %373 = vector.load %arg7[%372, %c10_280, %c0_281, %c0_282] : memref<9x11x2x128xf32, #tpu.memory_space<vmem>>, vector<1x1x2x128xf32>
        %374 = vector.shape_cast %373 : vector<1x1x2x128xf32> to vector<2x128xf32>
        %375 = vector.shape_cast %331 : vector<2x128xf32> to vector<1x1x2x128xf32>
        tpu.vector_store %arg7[%372, %c10_280, %c0_281, %c0_282], %375 {strides = array<i32>} : memref<9x11x2x128xf32, #tpu.memory_space<vmem>>, vector<1x1x2x128xf32>,
      }
      %c9_i32_239 = arith.constant 9 : i32
    } else {
    }
    %c0 = arith.constant 0 : index
    %c0_1 = arith.constant 0 : index
    %c0_2 = arith.constant 0 : index
    %c0_3 = arith.constant 0 : index
    %3 = vector.load %arg4[%c0, %c0_1, %c0_2, %c0_3] : memref<1x12x2x128xf32, #tpu.memory_space<vmem>>, vector<1x1x2x128xf32>
    %4 = vector.shape_cast %3 : vector<1x1x2x128xf32> to vector<2x128xf32>
    %cst = arith.constant 2.000000e+00 : f32
    %5 = vector.broadcast %cst : f32 to vector<2x128xf32>
    %6 = arith.mulf %4, %5 : vector<2x128xf32>
    %cst_4 = arith.constant 1.000000e+00 : f32
    %7 = vector.broadcast %cst_4 : f32 to vector<2x128xf32>
    %8 = arith.subf %6, %7 : vector<2x128xf32>
    %c0_5 = arith.constant 0 : index
    %c1 = arith.constant 1 : index
    %c0_6 = arith.constant 0 : index
    %c0_7 = arith.constant 0 : index
    %9 = vector.load %arg4[%c0_5, %c1, %c0_6, %c0_7] : memref<1x12x2x128xf32, #tpu.memory_space<vmem>>, vector<1x1x2x128xf32>
    %10 = vector.shape_cast %9 : vector<1x1x2x128xf32> to vector<2x128xf32>
    %cst_8 = arith.constant 2.000000e+00 : f32
    %11 = vector.broadcast %cst_8 : f32 to vector<2x128xf32>
    %12 = arith.mulf %10, %11 : vector<2x128xf32>
    %cst_9 = arith.constant 1.000000e+00 : f32
    %13 = vector.broadcast %cst_9 : f32 to vector<2x128xf32>
    %14 = arith.subf %12, %13 : vector<2x128xf32>
    %c0_10 = arith.constant 0 : index
    %c2 = arith.constant 2 : index
    %c0_11 = arith.constant 0 : index
    %c0_12 = arith.constant 0 : index
    %15 = vector.load %arg4[%c0_10, %c2, %c0_11, %c0_12] : memref<1x12x2x128xf32, #tpu.memory_space<vmem>>, vector<1x1x2x128xf32>
    %16 = vector.shape_cast %15 : vector<1x1x2x128xf32> to vector<2x128xf32>
    %cst_13 = arith.constant 2.000000e+00 : f32
    %17 = vector.broadcast %cst_13 : f32 to vector<2x128xf32>
    %18 = arith.mulf %16, %17 : vector<2x128xf32>
    %cst_14 = arith.constant 1.000000e+00 : f32
    %19 = vector.broadcast %cst_14 : f32 to vector<2x128xf32>
    %20 = arith.subf %18, %19 : vector<2x128xf32>
    %21 = arith.mulf %8, %8 : vector<2x128xf32>
    %22 = arith.mulf %14, %14 : vector<2x128xf32>
    %23 = arith.addf %21, %22 : vector<2x128xf32>
    %24 = arith.mulf %20, %20 : vector<2x128xf32>
    %25 = arith.addf %23, %24 : vector<2x128xf32>
    %cst_15 = arith.constant 9.99999996E-13 : f32
    %26 = vector.broadcast %cst_15 : f32 to vector<2x128xf32>
    %27 = arith.maximumf %25, %26 : vector<2x128xf32>
    %28 = math.rsqrt %27 : vector<2x128xf32>
    %29 = arith.mulf %8, %28 : vector<2x128xf32>
    %c0_16 = arith.constant 0 : index
    %c0_17 = arith.constant 0 : index
    %c0_18 = arith.constant 0 : index
    %c0_19 = arith.constant 0 : index
    %30 = vector.load %arg8[%c0_16, %c0_17, %c0_18, %c0_19] : memref<2x12x2x128xf32, #tpu.memory_space<vmem>>, vector<1x1x2x128xf32>
    %31 = vector.shape_cast %30 : vector<1x1x2x128xf32> to vector<2x128xf32>
    %32 = vector.shape_cast %29 : vector<2x128xf32> to vector<1x1x2x128xf32>
    tpu.vector_store %arg8[%c0_16, %c0_17, %c0_18, %c0_19], %32 {strides = array<i32>} : memref<2x12x2x128xf32, #tpu.memory_space<vmem>>, vector<1x1x2x128xf32>,
    %33 = arith.mulf %14, %28 : vector<2x128xf32>
    %c0_20 = arith.constant 0 : index
    %c1_21 = arith.constant 1 : index
    %c0_22 = arith.constant 0 : index
    %c0_23 = arith.constant 0 : index
    %34 = vector.load %arg8[%c0_20, %c1_21, %c0_22, %c0_23] : memref<2x12x2x128xf32, #tpu.memory_space<vmem>>, vector<1x1x2x128xf32>
    %35 = vector.shape_cast %34 : vector<1x1x2x128xf32> to vector<2x128xf32>
    %36 = vector.shape_cast %33 : vector<2x128xf32> to vector<1x1x2x128xf32>
    tpu.vector_store %arg8[%c0_20, %c1_21, %c0_22, %c0_23], %36 {strides = array<i32>} : memref<2x12x2x128xf32, #tpu.memory_space<vmem>>, vector<1x1x2x128xf32>,
    %37 = arith.mulf %20, %28 : vector<2x128xf32>
    %c0_24 = arith.constant 0 : index
    %c2_25 = arith.constant 2 : index
    %c0_26 = arith.constant 0 : index
    %c0_27 = arith.constant 0 : index
    %38 = vector.load %arg8[%c0_24, %c2_25, %c0_26, %c0_27] : memref<2x12x2x128xf32, #tpu.memory_space<vmem>>, vector<1x1x2x128xf32>
    %39 = vector.shape_cast %38 : vector<1x1x2x128xf32> to vector<2x128xf32>
    %40 = vector.shape_cast %37 : vector<2x128xf32> to vector<1x1x2x128xf32>
    tpu.vector_store %arg8[%c0_24, %c2_25, %c0_26, %c0_27], %40 {strides = array<i32>} : memref<2x12x2x128xf32, #tpu.memory_space<vmem>>, vector<1x1x2x128xf32>,
    %c0_28 = arith.constant 0 : index
    %c3 = arith.constant 3 : index
    %c0_29 = arith.constant 0 : index
    %c0_30 = arith.constant 0 : index
    %41 = vector.load %arg4[%c0_28, %c3, %c0_29, %c0_30] : memref<1x12x2x128xf32, #tpu.memory_space<vmem>>, vector<1x1x2x128xf32>
    %42 = vector.shape_cast %41 : vector<1x1x2x128xf32> to vector<2x128xf32>
    %c0_31 = arith.constant 0 : index
    %c6 = arith.constant 6 : index
    %c0_32 = arith.constant 0 : index
    %c0_33 = arith.constant 0 : index
    %43 = vector.load %arg4[%c0_31, %c6, %c0_32, %c0_33] : memref<1x12x2x128xf32, #tpu.memory_space<vmem>>, vector<1x1x2x128xf32>
    %44 = vector.shape_cast %43 : vector<1x1x2x128xf32> to vector<2x128xf32>
    %cst_34 = arith.constant 1.000000e-03 : f32
    %cst_35 = arith.constant 1.000000e+00 : f32
    %45 = vector.broadcast %cst_34 : f32 to vector<2x128xf32>
    %46 = arith.maximumf %45, %44 : vector<2x128xf32>
    %47 = vector.broadcast %cst_35 : f32 to vector<2x128xf32>
    %48 = arith.minimumf %47, %46 : vector<2x128xf32>
    %c0_36 = arith.constant 0 : index
    %c9 = arith.constant 9 : index
    %c0_37 = arith.constant 0 : index
    %c0_38 = arith.constant 0 : index
    %49 = vector.load %arg4[%c0_36, %c9, %c0_37, %c0_38] : memref<1x12x2x128xf32, #tpu.memory_space<vmem>>, vector<1x1x2x128xf32>
    %50 = vector.shape_cast %49 : vector<1x1x2x128xf32> to vector<2x128xf32>
    %51 = arith.mulf %48, %48 : vector<2x128xf32>
    %52 = arith.mulf %51, %51 : vector<2x128xf32>
    %c0_39 = arith.constant 0 : index
    %c3_40 = arith.constant 3 : index
    %c0_41 = arith.constant 0 : index
    %c0_42 = arith.constant 0 : index
    %53 = vector.load %arg8[%c0_39, %c3_40, %c0_41, %c0_42] : memref<2x12x2x128xf32, #tpu.memory_space<vmem>>, vector<1x1x2x128xf32>
    %54 = vector.shape_cast %53 : vector<1x1x2x128xf32> to vector<2x128xf32>
    %55 = vector.shape_cast %52 : vector<2x128xf32> to vector<1x1x2x128xf32>
    tpu.vector_store %arg8[%c0_39, %c3_40, %c0_41, %c0_42], %55 {strides = array<i32>} : memref<2x12x2x128xf32, #tpu.memory_space<vmem>>, vector<1x1x2x128xf32>,
    %c0_43 = arith.constant 0 : index
    %c6_44 = arith.constant 6 : index
    %c0_45 = arith.constant 0 : index
    %c0_46 = arith.constant 0 : index
    %56 = vector.load %arg8[%c0_43, %c6_44, %c0_45, %c0_46] : memref<2x12x2x128xf32, #tpu.memory_space<vmem>>, vector<1x1x2x128xf32>
    %57 = vector.shape_cast %56 : vector<1x1x2x128xf32> to vector<2x128xf32>
    %58 = vector.shape_cast %50 : vector<2x128xf32> to vector<1x1x2x128xf32>
    tpu.vector_store %arg8[%c0_43, %c6_44, %c0_45, %c0_46], %58 {strides = array<i32>} : memref<2x12x2x128xf32, #tpu.memory_space<vmem>>, vector<1x1x2x128xf32>,
    %cst_47 = arith.constant 1.000000e+00 : f32
    %59 = vector.broadcast %cst_47 : f32 to vector<2x128xf32>
    %60 = arith.subf %59, %50 : vector<2x128xf32>
    %61 = arith.mulf %42, %60 : vector<2x128xf32>
    %cst_48 = arith.constant 0.318309873 : f32
    %62 = vector.broadcast %cst_48 : f32 to vector<2x128xf32>
    %63 = arith.mulf %61, %62 : vector<2x128xf32>
    %c0_49 = arith.constant 0 : index
    %c9_50 = arith.constant 9 : index
    %c0_51 = arith.constant 0 : index
    %c0_52 = arith.constant 0 : index
    %64 = vector.load %arg8[%c0_49, %c9_50, %c0_51, %c0_52] : memref<2x12x2x128xf32, #tpu.memory_space<vmem>>, vector<1x1x2x128xf32>
    %65 = vector.shape_cast %64 : vector<1x1x2x128xf32> to vector<2x128xf32>
    %66 = vector.shape_cast %63 : vector<2x128xf32> to vector<1x1x2x128xf32>
    tpu.vector_store %arg8[%c0_49, %c9_50, %c0_51, %c0_52], %66 {strides = array<i32>} : memref<2x12x2x128xf32, #tpu.memory_space<vmem>>, vector<1x1x2x128xf32>,
    %c0_53 = arith.constant 0 : index
    %c4 = arith.constant 4 : index
    %c0_54 = arith.constant 0 : index
    %c0_55 = arith.constant 0 : index
    %67 = vector.load %arg4[%c0_53, %c4, %c0_54, %c0_55] : memref<1x12x2x128xf32, #tpu.memory_space<vmem>>, vector<1x1x2x128xf32>
    %68 = vector.shape_cast %67 : vector<1x1x2x128xf32> to vector<2x128xf32>
    %c0_56 = arith.constant 0 : index
    %c7 = arith.constant 7 : index
    %c0_57 = arith.constant 0 : index
    %c0_58 = arith.constant 0 : index
    %69 = vector.load %arg4[%c0_56, %c7, %c0_57, %c0_58] : memref<1x12x2x128xf32, #tpu.memory_space<vmem>>, vector<1x1x2x128xf32>
    %70 = vector.shape_cast %69 : vector<1x1x2x128xf32> to vector<2x128xf32>
    %cst_59 = arith.constant 1.000000e-03 : f32
    %cst_60 = arith.constant 1.000000e+00 : f32
    %71 = vector.broadcast %cst_59 : f32 to vector<2x128xf32>
    %72 = arith.maximumf %71, %70 : vector<2x128xf32>
    %73 = vector.broadcast %cst_60 : f32 to vector<2x128xf32>
    %74 = arith.minimumf %73, %72 : vector<2x128xf32>
    %c0_61 = arith.constant 0 : index
    %c10 = arith.constant 10 : index
    %c0_62 = arith.constant 0 : index
    %c0_63 = arith.constant 0 : index
    %75 = vector.load %arg4[%c0_61, %c10, %c0_62, %c0_63] : memref<1x12x2x128xf32, #tpu.memory_space<vmem>>, vector<1x1x2x128xf32>
    %76 = vector.shape_cast %75 : vector<1x1x2x128xf32> to vector<2x128xf32>
    %77 = arith.mulf %74, %74 : vector<2x128xf32>
    %78 = arith.mulf %77, %77 : vector<2x128xf32>
    %c0_64 = arith.constant 0 : index
    %c4_65 = arith.constant 4 : index
    %c0_66 = arith.constant 0 : index
    %c0_67 = arith.constant 0 : index
    %79 = vector.load %arg8[%c0_64, %c4_65, %c0_66, %c0_67] : memref<2x12x2x128xf32, #tpu.memory_space<vmem>>, vector<1x1x2x128xf32>
    %80 = vector.shape_cast %79 : vector<1x1x2x128xf32> to vector<2x128xf32>
    %81 = vector.shape_cast %78 : vector<2x128xf32> to vector<1x1x2x128xf32>
    tpu.vector_store %arg8[%c0_64, %c4_65, %c0_66, %c0_67], %81 {strides = array<i32>} : memref<2x12x2x128xf32, #tpu.memory_space<vmem>>, vector<1x1x2x128xf32>,
    %c0_68 = arith.constant 0 : index
    %c7_69 = arith.constant 7 : index
    %c0_70 = arith.constant 0 : index
    %c0_71 = arith.constant 0 : index
    %82 = vector.load %arg8[%c0_68, %c7_69, %c0_70, %c0_71] : memref<2x12x2x128xf32, #tpu.memory_space<vmem>>, vector<1x1x2x128xf32>
    %83 = vector.shape_cast %82 : vector<1x1x2x128xf32> to vector<2x128xf32>
    %84 = vector.shape_cast %76 : vector<2x128xf32> to vector<1x1x2x128xf32>
    tpu.vector_store %arg8[%c0_68, %c7_69, %c0_70, %c0_71], %84 {strides = array<i32>} : memref<2x12x2x128xf32, #tpu.memory_space<vmem>>, vector<1x1x2x128xf32>,
    %cst_72 = arith.constant 1.000000e+00 : f32
    %85 = vector.broadcast %cst_72 : f32 to vector<2x128xf32>
    %86 = arith.subf %85, %76 : vector<2x128xf32>
    %87 = arith.mulf %68, %86 : vector<2x128xf32>
    %cst_73 = arith.constant 0.318309873 : f32
    %88 = vector.broadcast %cst_73 : f32 to vector<2x128xf32>
    %89 = arith.mulf %87, %88 : vector<2x128xf32>
    %c0_74 = arith.constant 0 : index
    %c10_75 = arith.constant 10 : index
    %c0_76 = arith.constant 0 : index
    %c0_77 = arith.constant 0 : index
    %90 = vector.load %arg8[%c0_74, %c10_75, %c0_76, %c0_77] : memref<2x12x2x128xf32, #tpu.memory_space<vmem>>, vector<1x1x2x128xf32>
    %91 = vector.shape_cast %90 : vector<1x1x2x128xf32> to vector<2x128xf32>
    %92 = vector.shape_cast %89 : vector<2x128xf32> to vector<1x1x2x128xf32>
    tpu.vector_store %arg8[%c0_74, %c10_75, %c0_76, %c0_77], %92 {strides = array<i32>} : memref<2x12x2x128xf32, #tpu.memory_space<vmem>>, vector<1x1x2x128xf32>,
    %c0_78 = arith.constant 0 : index
    %c5 = arith.constant 5 : index
    %c0_79 = arith.constant 0 : index
    %c0_80 = arith.constant 0 : index
    %93 = vector.load %arg4[%c0_78, %c5, %c0_79, %c0_80] : memref<1x12x2x128xf32, #tpu.memory_space<vmem>>, vector<1x1x2x128xf32>
    %94 = vector.shape_cast %93 : vector<1x1x2x128xf32> to vector<2x128xf32>
    %c0_81 = arith.constant 0 : index
    %c8 = arith.constant 8 : index
    %c0_82 = arith.constant 0 : index
    %c0_83 = arith.constant 0 : index
    %95 = vector.load %arg4[%c0_81, %c8, %c0_82, %c0_83] : memref<1x12x2x128xf32, #tpu.memory_space<vmem>>, vector<1x1x2x128xf32>
    %96 = vector.shape_cast %95 : vector<1x1x2x128xf32> to vector<2x128xf32>
    %cst_84 = arith.constant 1.000000e-03 : f32
    %cst_85 = arith.constant 1.000000e+00 : f32
    %97 = vector.broadcast %cst_84 : f32 to vector<2x128xf32>
    %98 = arith.maximumf %97, %96 : vector<2x128xf32>
    %99 = vector.broadcast %cst_85 : f32 to vector<2x128xf32>
    %100 = arith.minimumf %99, %98 : vector<2x128xf32>
    %c0_86 = arith.constant 0 : index
    %c11 = arith.constant 11 : index
    %c0_87 = arith.constant 0 : index
    %c0_88 = arith.constant 0 : index
    %101 = vector.load %arg4[%c0_86, %c11, %c0_87, %c0_88] : memref<1x12x2x128xf32, #tpu.memory_space<vmem>>, vector<1x1x2x128xf32>
    %102 = vector.shape_cast %101 : vector<1x1x2x128xf32> to vector<2x128xf32>
    %103 = arith.mulf %100, %100 : vector<2x128xf32>
    %104 = arith.mulf %103, %103 : vector<2x128xf32>
    %c0_89 = arith.constant 0 : index
    %c5_90 = arith.constant 5 : index
    %c0_91 = arith.constant 0 : index
    %c0_92 = arith.constant 0 : index
    %105 = vector.load %arg8[%c0_89, %c5_90, %c0_91, %c0_92] : memref<2x12x2x128xf32, #tpu.memory_space<vmem>>, vector<1x1x2x128xf32>
    %106 = vector.shape_cast %105 : vector<1x1x2x128xf32> to vector<2x128xf32>
    %107 = vector.shape_cast %104 : vector<2x128xf32> to vector<1x1x2x128xf32>
    tpu.vector_store %arg8[%c0_89, %c5_90, %c0_91, %c0_92], %107 {strides = array<i32>} : memref<2x12x2x128xf32, #tpu.memory_space<vmem>>, vector<1x1x2x128xf32>,
    %c0_93 = arith.constant 0 : index
    %c8_94 = arith.constant 8 : index
    %c0_95 = arith.constant 0 : index
    %c0_96 = arith.constant 0 : index
    %108 = vector.load %arg8[%c0_93, %c8_94, %c0_95, %c0_96] : memref<2x12x2x128xf32, #tpu.memory_space<vmem>>, vector<1x1x2x128xf32>
    %109 = vector.shape_cast %108 : vector<1x1x2x128xf32> to vector<2x128xf32>
    %110 = vector.shape_cast %102 : vector<2x128xf32> to vector<1x1x2x128xf32>
    tpu.vector_store %arg8[%c0_93, %c8_94, %c0_95, %c0_96], %110 {strides = array<i32>} : memref<2x12x2x128xf32, #tpu.memory_space<vmem>>, vector<1x1x2x128xf32>,
    %cst_97 = arith.constant 1.000000e+00 : f32
    %111 = vector.broadcast %cst_97 : f32 to vector<2x128xf32>
    %112 = arith.subf %111, %102 : vector<2x128xf32>
    %113 = arith.mulf %94, %112 : vector<2x128xf32>
    %cst_98 = arith.constant 0.318309873 : f32
    %114 = vector.broadcast %cst_98 : f32 to vector<2x128xf32>
    %115 = arith.mulf %113, %114 : vector<2x128xf32>
    %c0_99 = arith.constant 0 : index
    %c11_100 = arith.constant 11 : index
    %c0_101 = arith.constant 0 : index
    %c0_102 = arith.constant 0 : index
    %116 = vector.load %arg8[%c0_99, %c11_100, %c0_101, %c0_102] : memref<2x12x2x128xf32, #tpu.memory_space<vmem>>, vector<1x1x2x128xf32>
    %117 = vector.shape_cast %116 : vector<1x1x2x128xf32> to vector<2x128xf32>
    %118 = vector.shape_cast %115 : vector<2x128xf32> to vector<1x1x2x128xf32>
    tpu.vector_store %arg8[%c0_99, %c11_100, %c0_101, %c0_102], %118 {strides = array<i32>} : memref<2x12x2x128xf32, #tpu.memory_space<vmem>>, vector<1x1x2x128xf32>,
    %c0_103 = arith.constant 0 : index
    %c0_104 = arith.constant 0 : index
    %c0_105 = arith.constant 0 : index
    %c0_106 = arith.constant 0 : index
    %119 = vector.load %arg5[%c0_103, %c0_104, %c0_105, %c0_106] : memref<1x12x2x128xf32, #tpu.memory_space<vmem>>, vector<1x1x2x128xf32>
    %120 = vector.shape_cast %119 : vector<1x1x2x128xf32> to vector<2x128xf32>
    %cst_107 = arith.constant 2.000000e+00 : f32
    %121 = vector.broadcast %cst_107 : f32 to vector<2x128xf32>
    %122 = arith.mulf %120, %121 : vector<2x128xf32>
    %cst_108 = arith.constant 1.000000e+00 : f32
    %123 = vector.broadcast %cst_108 : f32 to vector<2x128xf32>
    %124 = arith.subf %122, %123 : vector<2x128xf32>
    %c0_109 = arith.constant 0 : index
    %c1_110 = arith.constant 1 : index
    %c0_111 = arith.constant 0 : index
    %c0_112 = arith.constant 0 : index
    %125 = vector.load %arg5[%c0_109, %c1_110, %c0_111, %c0_112] : memref<1x12x2x128xf32, #tpu.memory_space<vmem>>, vector<1x1x2x128xf32>
    %126 = vector.shape_cast %125 : vector<1x1x2x128xf32> to vector<2x128xf32>
    %cst_113 = arith.constant 2.000000e+00 : f32
    %127 = vector.broadcast %cst_113 : f32 to vector<2x128xf32>
    %128 = arith.mulf %126, %127 : vector<2x128xf32>
    %cst_114 = arith.constant 1.000000e+00 : f32
    %129 = vector.broadcast %cst_114 : f32 to vector<2x128xf32>
    %130 = arith.subf %128, %129 : vector<2x128xf32>
    %c0_115 = arith.constant 0 : index
    %c2_116 = arith.constant 2 : index
    %c0_117 = arith.constant 0 : index
    %c0_118 = arith.constant 0 : index
    %131 = vector.load %arg5[%c0_115, %c2_116, %c0_117, %c0_118] : memref<1x12x2x128xf32, #tpu.memory_space<vmem>>, vector<1x1x2x128xf32>
    %132 = vector.shape_cast %131 : vector<1x1x2x128xf32> to vector<2x128xf32>
    %cst_119 = arith.constant 2.000000e+00 : f32
    %133 = vector.broadcast %cst_119 : f32 to vector<2x128xf32>
    %134 = arith.mulf %132, %133 : vector<2x128xf32>
    %cst_120 = arith.constant 1.000000e+00 : f32
    %135 = vector.broadcast %cst_120 : f32 to vector<2x128xf32>
    %136 = arith.subf %134, %135 : vector<2x128xf32>
    %137 = arith.mulf %124, %124 : vector<2x128xf32>
    %138 = arith.mulf %130, %130 : vector<2x128xf32>
    %139 = arith.addf %137, %138 : vector<2x128xf32>
    %140 = arith.mulf %136, %136 : vector<2x128xf32>
    %141 = arith.addf %139, %140 : vector<2x128xf32>
    %cst_121 = arith.constant 9.99999996E-13 : f32
    %142 = vector.broadcast %cst_121 : f32 to vector<2x128xf32>
    %143 = arith.maximumf %141, %142 : vector<2x128xf32>
    %144 = math.rsqrt %143 : vector<2x128xf32>
    %145 = arith.mulf %124, %144 : vector<2x128xf32>
    %c1_122 = arith.constant 1 : index
    %c0_123 = arith.constant 0 : index
    %c0_124 = arith.constant 0 : index
    %c0_125 = arith.constant 0 : index
    %146 = vector.load %arg8[%c1_122, %c0_123, %c0_124, %c0_125] : memref<2x12x2x128xf32, #tpu.memory_space<vmem>>, vector<1x1x2x128xf32>
    %147 = vector.shape_cast %146 : vector<1x1x2x128xf32> to vector<2x128xf32>
    %148 = vector.shape_cast %145 : vector<2x128xf32> to vector<1x1x2x128xf32>
    tpu.vector_store %arg8[%c1_122, %c0_123, %c0_124, %c0_125], %148 {strides = array<i32>} : memref<2x12x2x128xf32, #tpu.memory_space<vmem>>, vector<1x1x2x128xf32>,
    %149 = arith.mulf %130, %144 : vector<2x128xf32>
    %c1_126 = arith.constant 1 : index
    %c1_127 = arith.constant 1 : index
    %c0_128 = arith.constant 0 : index
    %c0_129 = arith.constant 0 : index
    %150 = vector.load %arg8[%c1_126, %c1_127, %c0_128, %c0_129] : memref<2x12x2x128xf32, #tpu.memory_space<vmem>>, vector<1x1x2x128xf32>
    %151 = vector.shape_cast %150 : vector<1x1x2x128xf32> to vector<2x128xf32>
    %152 = vector.shape_cast %149 : vector<2x128xf32> to vector<1x1x2x128xf32>
    tpu.vector_store %arg8[%c1_126, %c1_127, %c0_128, %c0_129], %152 {strides = array<i32>} : memref<2x12x2x128xf32, #tpu.memory_space<vmem>>, vector<1x1x2x128xf32>,
    %153 = arith.mulf %136, %144 : vector<2x128xf32>
    %c1_130 = arith.constant 1 : index
    %c2_131 = arith.constant 2 : index
    %c0_132 = arith.constant 0 : index
    %c0_133 = arith.constant 0 : index
    %154 = vector.load %arg8[%c1_130, %c2_131, %c0_132, %c0_133] : memref<2x12x2x128xf32, #tpu.memory_space<vmem>>, vector<1x1x2x128xf32>
    %155 = vector.shape_cast %154 : vector<1x1x2x128xf32> to vector<2x128xf32>
    %156 = vector.shape_cast %153 : vector<2x128xf32> to vector<1x1x2x128xf32>
    tpu.vector_store %arg8[%c1_130, %c2_131, %c0_132, %c0_133], %156 {strides = array<i32>} : memref<2x12x2x128xf32, #tpu.memory_space<vmem>>, vector<1x1x2x128xf32>,
    %c0_134 = arith.constant 0 : index
    %c3_135 = arith.constant 3 : index
    %c0_136 = arith.constant 0 : index
    %c0_137 = arith.constant 0 : index
    %157 = vector.load %arg5[%c0_134, %c3_135, %c0_136, %c0_137] : memref<1x12x2x128xf32, #tpu.memory_space<vmem>>, vector<1x1x2x128xf32>
    %158 = vector.shape_cast %157 : vector<1x1x2x128xf32> to vector<2x128xf32>
    %c0_138 = arith.constant 0 : index
    %c6_139 = arith.constant 6 : index
    %c0_140 = arith.constant 0 : index
    %c0_141 = arith.constant 0 : index
    %159 = vector.load %arg5[%c0_138, %c6_139, %c0_140, %c0_141] : memref<1x12x2x128xf32, #tpu.memory_space<vmem>>, vector<1x1x2x128xf32>
    %160 = vector.shape_cast %159 : vector<1x1x2x128xf32> to vector<2x128xf32>
    %cst_142 = arith.constant 1.000000e-03 : f32
    %cst_143 = arith.constant 1.000000e+00 : f32
    %161 = vector.broadcast %cst_142 : f32 to vector<2x128xf32>
    %162 = arith.maximumf %161, %160 : vector<2x128xf32>
    %163 = vector.broadcast %cst_143 : f32 to vector<2x128xf32>
    %164 = arith.minimumf %163, %162 : vector<2x128xf32>
    %c0_144 = arith.constant 0 : index
    %c9_145 = arith.constant 9 : index
    %c0_146 = arith.constant 0 : index
    %c0_147 = arith.constant 0 : index
    %165 = vector.load %arg5[%c0_144, %c9_145, %c0_146, %c0_147] : memref<1x12x2x128xf32, #tpu.memory_space<vmem>>, vector<1x1x2x128xf32>
    %166 = vector.shape_cast %165 : vector<1x1x2x128xf32> to vector<2x128xf32>
    %167 = arith.mulf %164, %164 : vector<2x128xf32>
    %168 = arith.mulf %167, %167 : vector<2x128xf32>
    %c1_148 = arith.constant 1 : index
    %c3_149 = arith.constant 3 : index
    %c0_150 = arith.constant 0 : index
    %c0_151 = arith.constant 0 : index
    %169 = vector.load %arg8[%c1_148, %c3_149, %c0_150, %c0_151] : memref<2x12x2x128xf32, #tpu.memory_space<vmem>>, vector<1x1x2x128xf32>
    %170 = vector.shape_cast %169 : vector<1x1x2x128xf32> to vector<2x128xf32>
    %171 = vector.shape_cast %168 : vector<2x128xf32> to vector<1x1x2x128xf32>
    tpu.vector_store %arg8[%c1_148, %c3_149, %c0_150, %c0_151], %171 {strides = array<i32>} : memref<2x12x2x128xf32, #tpu.memory_space<vmem>>, vector<1x1x2x128xf32>,
    %c1_152 = arith.constant 1 : index
    %c6_153 = arith.constant 6 : index
    %c0_154 = arith.constant 0 : index
    %c0_155 = arith.constant 0 : index
    %172 = vector.load %arg8[%c1_152, %c6_153, %c0_154, %c0_155] : memref<2x12x2x128xf32, #tpu.memory_space<vmem>>, vector<1x1x2x128xf32>
    %173 = vector.shape_cast %172 : vector<1x1x2x128xf32> to vector<2x128xf32>
    %174 = vector.shape_cast %166 : vector<2x128xf32> to vector<1x1x2x128xf32>
    tpu.vector_store %arg8[%c1_152, %c6_153, %c0_154, %c0_155], %174 {strides = array<i32>} : memref<2x12x2x128xf32, #tpu.memory_space<vmem>>, vector<1x1x2x128xf32>,
    %cst_156 = arith.constant 1.000000e+00 : f32
    %175 = vector.broadcast %cst_156 : f32 to vector<2x128xf32>
    %176 = arith.subf %175, %166 : vector<2x128xf32>
    %177 = arith.mulf %158, %176 : vector<2x128xf32>
    %cst_157 = arith.constant 0.318309873 : f32
    %178 = vector.broadcast %cst_157 : f32 to vector<2x128xf32>
    %179 = arith.mulf %177, %178 : vector<2x128xf32>
    %c1_158 = arith.constant 1 : index
    %c9_159 = arith.constant 9 : index
    %c0_160 = arith.constant 0 : index
    %c0_161 = arith.constant 0 : index
    %180 = vector.load %arg8[%c1_158, %c9_159, %c0_160, %c0_161] : memref<2x12x2x128xf32, #tpu.memory_space<vmem>>, vector<1x1x2x128xf32>
    %181 = vector.shape_cast %180 : vector<1x1x2x128xf32> to vector<2x128xf32>
    %182 = vector.shape_cast %179 : vector<2x128xf32> to vector<1x1x2x128xf32>
    tpu.vector_store %arg8[%c1_158, %c9_159, %c0_160, %c0_161], %182 {strides = array<i32>} : memref<2x12x2x128xf32, #tpu.memory_space<vmem>>, vector<1x1x2x128xf32>,
    %c0_162 = arith.constant 0 : index
    %c4_163 = arith.constant 4 : index
    %c0_164 = arith.constant 0 : index
    %c0_165 = arith.constant 0 : index
    %183 = vector.load %arg5[%c0_162, %c4_163, %c0_164, %c0_165] : memref<1x12x2x128xf32, #tpu.memory_space<vmem>>, vector<1x1x2x128xf32>
    %184 = vector.shape_cast %183 : vector<1x1x2x128xf32> to vector<2x128xf32>
    %c0_166 = arith.constant 0 : index
    %c7_167 = arith.constant 7 : index
    %c0_168 = arith.constant 0 : index
    %c0_169 = arith.constant 0 : index
    %185 = vector.load %arg5[%c0_166, %c7_167, %c0_168, %c0_169] : memref<1x12x2x128xf32, #tpu.memory_space<vmem>>, vector<1x1x2x128xf32>
    %186 = vector.shape_cast %185 : vector<1x1x2x128xf32> to vector<2x128xf32>
    %cst_170 = arith.constant 1.000000e-03 : f32
    %cst_171 = arith.constant 1.000000e+00 : f32
    %187 = vector.broadcast %cst_170 : f32 to vector<2x128xf32>
    %188 = arith.maximumf %187, %186 : vector<2x128xf32>
    %189 = vector.broadcast %cst_171 : f32 to vector<2x128xf32>
    %190 = arith.minimumf %189, %188 : vector<2x128xf32>
    %c0_172 = arith.constant 0 : index
    %c10_173 = arith.constant 10 : index
    %c0_174 = arith.constant 0 : index
    %c0_175 = arith.constant 0 : index
    %191 = vector.load %arg5[%c0_172, %c10_173, %c0_174, %c0_175] : memref<1x12x2x128xf32, #tpu.memory_space<vmem>>, vector<1x1x2x128xf32>
    %192 = vector.shape_cast %191 : vector<1x1x2x128xf32> to vector<2x128xf32>
    %193 = arith.mulf %190, %190 : vector<2x128xf32>
    %194 = arith.mulf %193, %193 : vector<2x128xf32>
    %c1_176 = arith.constant 1 : index
    %c4_177 = arith.constant 4 : index
    %c0_178 = arith.constant 0 : index
    %c0_179 = arith.constant 0 : index
    %195 = vector.load %arg8[%c1_176, %c4_177, %c0_178, %c0_179] : memref<2x12x2x128xf32, #tpu.memory_space<vmem>>, vector<1x1x2x128xf32>
    %196 = vector.shape_cast %195 : vector<1x1x2x128xf32> to vector<2x128xf32>
    %197 = vector.shape_cast %194 : vector<2x128xf32> to vector<1x1x2x128xf32>
    tpu.vector_store %arg8[%c1_176, %c4_177, %c0_178, %c0_179], %197 {strides = array<i32>} : memref<2x12x2x128xf32, #tpu.memory_space<vmem>>, vector<1x1x2x128xf32>,
    %c1_180 = arith.constant 1 : index
    %c7_181 = arith.constant 7 : index
    %c0_182 = arith.constant 0 : index
    %c0_183 = arith.constant 0 : index
    %198 = vector.load %arg8[%c1_180, %c7_181, %c0_182, %c0_183] : memref<2x12x2x128xf32, #tpu.memory_space<vmem>>, vector<1x1x2x128xf32>
    %199 = vector.shape_cast %198 : vector<1x1x2x128xf32> to vector<2x128xf32>
    %200 = vector.shape_cast %192 : vector<2x128xf32> to vector<1x1x2x128xf32>
    tpu.vector_store %arg8[%c1_180, %c7_181, %c0_182, %c0_183], %200 {strides = array<i32>} : memref<2x12x2x128xf32, #tpu.memory_space<vmem>>, vector<1x1x2x128xf32>,
    %cst_184 = arith.constant 1.000000e+00 : f32
    %201 = vector.broadcast %cst_184 : f32 to vector<2x128xf32>
    %202 = arith.subf %201, %192 : vector<2x128xf32>
    %203 = arith.mulf %184, %202 : vector<2x128xf32>
    %cst_185 = arith.constant 0.318309873 : f32
    %204 = vector.broadcast %cst_185 : f32 to vector<2x128xf32>
    %205 = arith.mulf %203, %204 : vector<2x128xf32>
    %c1_186 = arith.constant 1 : index
    %c10_187 = arith.constant 10 : index
    %c0_188 = arith.constant 0 : index
    %c0_189 = arith.constant 0 : index
    %206 = vector.load %arg8[%c1_186, %c10_187, %c0_188, %c0_189] : memref<2x12x2x128xf32, #tpu.memory_space<vmem>>, vector<1x1x2x128xf32>
    %207 = vector.shape_cast %206 : vector<1x1x2x128xf32> to vector<2x128xf32>
    %208 = vector.shape_cast %205 : vector<2x128xf32> to vector<1x1x2x128xf32>
    tpu.vector_store %arg8[%c1_186, %c10_187, %c0_188, %c0_189], %208 {strides = array<i32>} : memref<2x12x2x128xf32, #tpu.memory_space<vmem>>, vector<1x1x2x128xf32>,
    %c0_190 = arith.constant 0 : index
    %c5_191 = arith.constant 5 : index
    %c0_192 = arith.constant 0 : index
    %c0_193 = arith.constant 0 : index
    %209 = vector.load %arg5[%c0_190, %c5_191, %c0_192, %c0_193] : memref<1x12x2x128xf32, #tpu.memory_space<vmem>>, vector<1x1x2x128xf32>
    %210 = vector.shape_cast %209 : vector<1x1x2x128xf32> to vector<2x128xf32>
    %c0_194 = arith.constant 0 : index
    %c8_195 = arith.constant 8 : index
    %c0_196 = arith.constant 0 : index
    %c0_197 = arith.constant 0 : index
    %211 = vector.load %arg5[%c0_194, %c8_195, %c0_196, %c0_197] : memref<1x12x2x128xf32, #tpu.memory_space<vmem>>, vector<1x1x2x128xf32>
    %212 = vector.shape_cast %211 : vector<1x1x2x128xf32> to vector<2x128xf32>
    %cst_198 = arith.constant 1.000000e-03 : f32
    %cst_199 = arith.constant 1.000000e+00 : f32
    %213 = vector.broadcast %cst_198 : f32 to vector<2x128xf32>
    %214 = arith.maximumf %213, %212 : vector<2x128xf32>
    %215 = vector.broadcast %cst_199 : f32 to vector<2x128xf32>
    %216 = arith.minimumf %215, %214 : vector<2x128xf32>
    %c0_200 = arith.constant 0 : index
    %c11_201 = arith.constant 11 : index
    %c0_202 = arith.constant 0 : index
    %c0_203 = arith.constant 0 : index
    %217 = vector.load %arg5[%c0_200, %c11_201, %c0_202, %c0_203] : memref<1x12x2x128xf32, #tpu.memory_space<vmem>>, vector<1x1x2x128xf32>
    %218 = vector.shape_cast %217 : vector<1x1x2x128xf32> to vector<2x128xf32>
    %219 = arith.mulf %216, %216 : vector<2x128xf32>
    %220 = arith.mulf %219, %219 : vector<2x128xf32>
    %c1_204 = arith.constant 1 : index
    %c5_205 = arith.constant 5 : index
    %c0_206 = arith.constant 0 : index
    %c0_207 = arith.constant 0 : index
    %221 = vector.load %arg8[%c1_204, %c5_205, %c0_206, %c0_207] : memref<2x12x2x128xf32, #tpu.memory_space<vmem>>, vector<1x1x2x128xf32>
    %222 = vector.shape_cast %221 : vector<1x1x2x128xf32> to vector<2x128xf32>
    %223 = vector.shape_cast %220 : vector<2x128xf32> to vector<1x1x2x128xf32>
    tpu.vector_store %arg8[%c1_204, %c5_205, %c0_206, %c0_207], %223 {strides = array<i32>} : memref<2x12x2x128xf32, #tpu.memory_space<vmem>>, vector<1x1x2x128xf32>,
    %c1_208 = arith.constant 1 : index
    %c8_209 = arith.constant 8 : index
    %c0_210 = arith.constant 0 : index
    %c0_211 = arith.constant 0 : index
    %224 = vector.load %arg8[%c1_208, %c8_209, %c0_210, %c0_211] : memref<2x12x2x128xf32, #tpu.memory_space<vmem>>, vector<1x1x2x128xf32>
    %225 = vector.shape_cast %224 : vector<1x1x2x128xf32> to vector<2x128xf32>
    %226 = vector.shape_cast %218 : vector<2x128xf32> to vector<1x1x2x128xf32>
    tpu.vector_store %arg8[%c1_208, %c8_209, %c0_210, %c0_211], %226 {strides = array<i32>} : memref<2x12x2x128xf32, #tpu.memory_space<vmem>>, vector<1x1x2x128xf32>,
    %cst_212 = arith.constant 1.000000e+00 : f32
    %227 = vector.broadcast %cst_212 : f32 to vector<2x128xf32>
    %228 = arith.subf %227, %218 : vector<2x128xf32>
    %229 = arith.mulf %210, %228 : vector<2x128xf32>
    %cst_213 = arith.constant 0.318309873 : f32
    %230 = vector.broadcast %cst_213 : f32 to vector<2x128xf32>
    %231 = arith.mulf %229, %230 : vector<2x128xf32>
    %c1_214 = arith.constant 1 : index
    %c11_215 = arith.constant 11 : index
    %c0_216 = arith.constant 0 : index
    %c0_217 = arith.constant 0 : index
    %232 = vector.load %arg8[%c1_214, %c11_215, %c0_216, %c0_217] : memref<2x12x2x128xf32, #tpu.memory_space<vmem>>, vector<1x1x2x128xf32>
    %233 = vector.shape_cast %232 : vector<1x1x2x128xf32> to vector<2x128xf32>
    %234 = vector.shape_cast %231 : vector<2x128xf32> to vector<1x1x2x128xf32>
    tpu.vector_store %arg8[%c1_214, %c11_215, %c0_216, %c0_217], %234 {strides = array<i32>} : memref<2x12x2x128xf32, #tpu.memory_space<vmem>>, vector<1x1x2x128xf32>,
    %cst_218 = arith.constant 0.000000e+00 : f32
    %235 = vector.broadcast %cst_218 : f32 to vector<2x128xf32>
    %c0_219 = arith.constant 0 : index
    %c0_220 = arith.constant 0 : index
    %236 = vector.load %arg9[%c0_219, %c0_220] : memref<2x128xf32, #tpu.memory_space<vmem>>, vector<2x128xf32>
    tpu.vector_store %arg9[%c0_219, %c0_220], %235 {strides = array<i32>} : memref<2x128xf32, #tpu.memory_space<vmem>>, vector<2x128xf32>,
    %c0_i32_221 = arith.constant 0 : i32
    %c9_i32 = arith.constant 9 : i32
    %237 = arith.addi %c0_i32_221, %c9_i32 : i32
    %c1_i32 = arith.constant 1 : i32
    scf.for %arg10 = %c0_i32_221 to %237 step %c1_i32  : i32 {
      %c1_i32_230 = arith.constant 1 : i32
      %245 = arith.muli %arg10, %c1_i32_230 : i32
      %c0_i32_231 = arith.constant 0 : i32
      %246 = arith.addi %c0_i32_231, %245 : i32
      %c9_i32_232 = arith.constant 9 : i32
      %247 = arith.muli %246, %c9_i32_232 : i32
      %c6_i32 = arith.constant 6 : i32
      %248 = arith.addi %247, %c6_i32 : i32
      %249 = arith.index_cast %248 : i32 to index
      %250 = memref.load %arg2[%249] : memref<81xf32, #tpu.memory_space<smem>>
      %c7_i32 = arith.constant 7 : i32
      %251 = arith.addi %247, %c7_i32 : i32
      %252 = arith.index_cast %251 : i32 to index
      %253 = memref.load %arg2[%252] : memref<81xf32, #tpu.memory_space<smem>>
      %c8_i32 = arith.constant 8 : i32
      %254 = arith.addi %247, %c8_i32 : i32
      %255 = arith.index_cast %254 : i32 to index
      %256 = memref.load %arg2[%255] : memref<81xf32, #tpu.memory_space<smem>>
      %257 = arith.index_cast %246 : i32 to index
      %c0_233 = arith.constant 0 : index
      %c0_234 = arith.constant 0 : index
      %c0_235 = arith.constant 0 : index
      %258 = vector.load %arg7[%257, %c0_233, %c0_234, %c0_235] : memref<9x11x2x128xf32, #tpu.memory_space<vmem>>, vector<1x1x2x128xf32>
      %259 = vector.shape_cast %258 : vector<1x1x2x128xf32> to vector<2x128xf32>
      %260 = arith.index_cast %246 : i32 to index
      %c1_236 = arith.constant 1 : index
      %c0_237 = arith.constant 0 : index
      %c0_238 = arith.constant 0 : index
      %261 = vector.load %arg7[%260, %c1_236, %c0_237, %c0_238] : memref<9x11x2x128xf32, #tpu.memory_space<vmem>>, vector<1x1x2x128xf32>
      %262 = vector.shape_cast %261 : vector<1x1x2x128xf32> to vector<2x128xf32>
      %263 = arith.index_cast %246 : i32 to index
      %c2_239 = arith.constant 2 : index
      %c0_240 = arith.constant 0 : index
      %c0_241 = arith.constant 0 : index
      %264 = vector.load %arg7[%263, %c2_239, %c0_240, %c0_241] : memref<9x11x2x128xf32, #tpu.memory_space<vmem>>, vector<1x1x2x128xf32>
      %265 = vector.shape_cast %264 : vector<1x1x2x128xf32> to vector<2x128xf32>
      %266 = arith.index_cast %246 : i32 to index
      %c3_242 = arith.constant 3 : index
      %c0_243 = arith.constant 0 : index
      %c0_244 = arith.constant 0 : index
      %267 = vector.load %arg7[%266, %c3_242, %c0_243, %c0_244] : memref<9x11x2x128xf32, #tpu.memory_space<vmem>>, vector<1x1x2x128xf32>
      %268 = vector.shape_cast %267 : vector<1x1x2x128xf32> to vector<2x128xf32>
      %269 = arith.index_cast %246 : i32 to index
      %c4_245 = arith.constant 4 : index
      %c0_246 = arith.constant 0 : index
      %c0_247 = arith.constant 0 : index
      %270 = vector.load %arg7[%269, %c4_245, %c0_246, %c0_247] : memref<9x11x2x128xf32, #tpu.memory_space<vmem>>, vector<1x1x2x128xf32>
      %271 = vector.shape_cast %270 : vector<1x1x2x128xf32> to vector<2x128xf32>
      %272 = arith.index_cast %246 : i32 to index
      %c5_248 = arith.constant 5 : index
      %c0_249 = arith.constant 0 : index
      %c0_250 = arith.constant 0 : index
      %273 = vector.load %arg7[%272, %c5_248, %c0_249, %c0_250] : memref<9x11x2x128xf32, #tpu.memory_space<vmem>>, vector<1x1x2x128xf32>
      %274 = vector.shape_cast %273 : vector<1x1x2x128xf32> to vector<2x128xf32>
      %275 = arith.index_cast %246 : i32 to index
      %c6_251 = arith.constant 6 : index
      %c0_252 = arith.constant 0 : index
      %c0_253 = arith.constant 0 : index
      %276 = vector.load %arg7[%275, %c6_251, %c0_252, %c0_253] : memref<9x11x2x128xf32, #tpu.memory_space<vmem>>, vector<1x1x2x128xf32>
      %277 = vector.shape_cast %276 : vector<1x1x2x128xf32> to vector<2x128xf32>
      %278 = arith.index_cast %246 : i32 to index
      %c7_254 = arith.constant 7 : index
      %c0_255 = arith.constant 0 : index
      %c0_256 = arith.constant 0 : index
      %279 = vector.load %arg7[%278, %c7_254, %c0_255, %c0_256] : memref<9x11x2x128xf32, #tpu.memory_space<vmem>>, vector<1x1x2x128xf32>
      %280 = vector.shape_cast %279 : vector<1x1x2x128xf32> to vector<2x128xf32>
      %281 = arith.index_cast %246 : i32 to index
      %c8_257 = arith.constant 8 : index
      %c0_258 = arith.constant 0 : index
      %c0_259 = arith.constant 0 : index
      %282 = vector.load %arg7[%281, %c8_257, %c0_258, %c0_259] : memref<9x11x2x128xf32, #tpu.memory_space<vmem>>, vector<1x1x2x128xf32>
      %283 = vector.shape_cast %282 : vector<1x1x2x128xf32> to vector<2x128xf32>
      %284 = arith.index_cast %246 : i32 to index
      %c9_260 = arith.constant 9 : index
      %c0_261 = arith.constant 0 : index
      %c0_262 = arith.constant 0 : index
      %285 = vector.load %arg7[%284, %c9_260, %c0_261, %c0_262] : memref<9x11x2x128xf32, #tpu.memory_space<vmem>>, vector<1x1x2x128xf32>
      %286 = vector.shape_cast %285 : vector<1x1x2x128xf32> to vector<2x128xf32>
      %287 = arith.index_cast %246 : i32 to index
      %c10_263 = arith.constant 10 : index
      %c0_264 = arith.constant 0 : index
      %c0_265 = arith.constant 0 : index
      %288 = vector.load %arg7[%287, %c10_263, %c0_264, %c0_265] : memref<9x11x2x128xf32, #tpu.memory_space<vmem>>, vector<1x1x2x128xf32>
      %289 = vector.shape_cast %288 : vector<1x1x2x128xf32> to vector<2x128xf32>
      %cst_266 = arith.constant 1.000000e+00 : f32
      %290 = vector.broadcast %cst_266 : f32 to vector<2x128xf32>
      %291 = arith.subf %290, %289 : vector<2x128xf32>
      %c0_267 = arith.constant 0 : index
      %c0_268 = arith.constant 0 : index
      %c0_269 = arith.constant 0 : index
      %c0_270 = arith.constant 0 : index
      %292 = vector.load %arg8[%c0_267, %c0_268, %c0_269, %c0_270] : memref<2x12x2x128xf32, #tpu.memory_space<vmem>>, vector<1x1x2x128xf32>
      %293 = vector.shape_cast %292 : vector<1x1x2x128xf32> to vector<2x128xf32>
      %c0_271 = arith.constant 0 : index
      %c1_272 = arith.constant 1 : index
      %c0_273 = arith.constant 0 : index
      %c0_274 = arith.constant 0 : index
      %294 = vector.load %arg8[%c0_271, %c1_272, %c0_273, %c0_274] : memref<2x12x2x128xf32, #tpu.memory_space<vmem>>, vector<1x1x2x128xf32>
      %295 = vector.shape_cast %294 : vector<1x1x2x128xf32> to vector<2x128xf32>
      %c0_275 = arith.constant 0 : index
      %c2_276 = arith.constant 2 : index
      %c0_277 = arith.constant 0 : index
      %c0_278 = arith.constant 0 : index
      %296 = vector.load %arg8[%c0_275, %c2_276, %c0_277, %c0_278] : memref<2x12x2x128xf32, #tpu.memory_space<vmem>>, vector<1x1x2x128xf32>
      %297 = vector.shape_cast %296 : vector<1x1x2x128xf32> to vector<2x128xf32>
      %298 = arith.mulf %293, %277 : vector<2x128xf32>
      %299 = arith.mulf %295, %280 : vector<2x128xf32>
      %300 = arith.addf %298, %299 : vector<2x128xf32>
      %301 = arith.mulf %297, %283 : vector<2x128xf32>
      %302 = arith.addf %300, %301 : vector<2x128xf32>
      %cst_279 = arith.constant 1.000000e-03 : f32
      %303 = vector.broadcast %cst_279 : f32 to vector<2x128xf32>
      %304 = arith.maximumf %302, %303 : vector<2x128xf32>
      %305 = arith.mulf %259, %293 : vector<2x128xf32>
      %306 = arith.mulf %262, %295 : vector<2x128xf32>
      %307 = arith.addf %305, %306 : vector<2x128xf32>
      %308 = arith.mulf %265, %297 : vector<2x128xf32>
      %309 = arith.addf %307, %308 : vector<2x128xf32>
      %cst_280 = arith.constant 1.000000e-03 : f32
      %310 = vector.broadcast %cst_280 : f32 to vector<2x128xf32>
      %311 = arith.maximumf %309, %310 : vector<2x128xf32>
      %312 = arith.mulf %268, %293 : vector<2x128xf32>
      %313 = arith.mulf %271, %295 : vector<2x128xf32>
      %314 = arith.addf %312, %313 : vector<2x128xf32>
      %315 = arith.mulf %274, %297 : vector<2x128xf32>
      %316 = arith.addf %314, %315 : vector<2x128xf32>
      %cst_281 = arith.constant 1.000000e-03 : f32
      %317 = vector.broadcast %cst_281 : f32 to vector<2x128xf32>
      %318 = arith.maximumf %316, %317 : vector<2x128xf32>
      %cst_282 = arith.constant 0.000000e+00 : f32
      %319 = vector.broadcast %cst_282 : f32 to vector<2x128xf32>
      %320 = arith.maximumf %316, %319 : vector<2x128xf32>
      %321 = arith.mulf %320, %286 : vector<2x128xf32>
      %322 = arith.mulf %304, %304 : vector<2x128xf32>
      %323 = arith.mulf %311, %311 : vector<2x128xf32>
      %324 = arith.mulf %318, %318 : vector<2x128xf32>
      %c1_283 = arith.constant 1 : index
      %c0_284 = arith.constant 0 : index
      %c0_285 = arith.constant 0 : index
      %c0_286 = arith.constant 0 : index
      %325 = vector.load %arg8[%c1_283, %c0_284, %c0_285, %c0_286] : memref<2x12x2x128xf32, #tpu.memory_space<vmem>>, vector<1x1x2x128xf32>
      %326 = vector.shape_cast %325 : vector<1x1x2x128xf32> to vector<2x128xf32>
      %c1_287 = arith.constant 1 : index
      %c1_288 = arith.constant 1 : index
      %c0_289 = arith.constant 0 : index
      %c0_290 = arith.constant 0 : index
      %327 = vector.load %arg8[%c1_287, %c1_288, %c0_289, %c0_290] : memref<2x12x2x128xf32, #tpu.memory_space<vmem>>, vector<1x1x2x128xf32>
      %328 = vector.shape_cast %327 : vector<1x1x2x128xf32> to vector<2x128xf32>
      %c1_291 = arith.constant 1 : index
      %c2_292 = arith.constant 2 : index
      %c0_293 = arith.constant 0 : index
      %c0_294 = arith.constant 0 : index
      %329 = vector.load %arg8[%c1_291, %c2_292, %c0_293, %c0_294] : memref<2x12x2x128xf32, #tpu.memory_space<vmem>>, vector<1x1x2x128xf32>
      %330 = vector.shape_cast %329 : vector<1x1x2x128xf32> to vector<2x128xf32>
      %331 = arith.mulf %326, %277 : vector<2x128xf32>
      %332 = arith.mulf %328, %280 : vector<2x128xf32>
      %333 = arith.addf %331, %332 : vector<2x128xf32>
      %334 = arith.mulf %330, %283 : vector<2x128xf32>
      %335 = arith.addf %333, %334 : vector<2x128xf32>
      %cst_295 = arith.constant 1.000000e-03 : f32
      %336 = vector.broadcast %cst_295 : f32 to vector<2x128xf32>
      %337 = arith.maximumf %335, %336 : vector<2x128xf32>
      %338 = arith.mulf %259, %326 : vector<2x128xf32>
      %339 = arith.mulf %262, %328 : vector<2x128xf32>
      %340 = arith.addf %338, %339 : vector<2x128xf32>
      %341 = arith.mulf %265, %330 : vector<2x128xf32>
      %342 = arith.addf %340, %341 : vector<2x128xf32>
      %cst_296 = arith.constant 1.000000e-03 : f32
      %343 = vector.broadcast %cst_296 : f32 to vector<2x128xf32>
      %344 = arith.maximumf %342, %343 : vector<2x128xf32>
      %345 = arith.mulf %268, %326 : vector<2x128xf32>
      %346 = arith.mulf %271, %328 : vector<2x128xf32>
      %347 = arith.addf %345, %346 : vector<2x128xf32>
      %348 = arith.mulf %274, %330 : vector<2x128xf32>
      %349 = arith.addf %347, %348 : vector<2x128xf32>
      %cst_297 = arith.constant 1.000000e-03 : f32
      %350 = vector.broadcast %cst_297 : f32 to vector<2x128xf32>
      %351 = arith.maximumf %349, %350 : vector<2x128xf32>
      %cst_298 = arith.constant 0.000000e+00 : f32
      %352 = vector.broadcast %cst_298 : f32 to vector<2x128xf32>
      %353 = arith.maximumf %349, %352 : vector<2x128xf32>
      %354 = arith.mulf %353, %286 : vector<2x128xf32>
      %355 = arith.mulf %337, %337 : vector<2x128xf32>
      %356 = arith.mulf %344, %344 : vector<2x128xf32>
      %357 = arith.mulf %351, %351 : vector<2x128xf32>
      %c0_299 = arith.constant 0 : index
      %c0_300 = arith.constant 0 : index
      %358 = vector.load %arg9[%c0_299, %c0_300] : memref<2x128xf32, #tpu.memory_space<vmem>>, vector<2x128xf32>
      %c0_301 = arith.constant 0 : index
      %c3_302 = arith.constant 3 : index
      %c0_303 = arith.constant 0 : index
      %c0_304 = arith.constant 0 : index
      %359 = vector.load %arg8[%c0_301, %c3_302, %c0_303, %c0_304] : memref<2x12x2x128xf32, #tpu.memory_space<vmem>>, vector<1x1x2x128xf32>
      %360 = vector.shape_cast %359 : vector<1x1x2x128xf32> to vector<2x128xf32>
      %c0_305 = arith.constant 0 : index
      %c6_306 = arith.constant 6 : index
      %c0_307 = arith.constant 0 : index
      %c0_308 = arith.constant 0 : index
      %361 = vector.load %arg8[%c0_305, %c6_306, %c0_307, %c0_308] : memref<2x12x2x128xf32, #tpu.memory_space<vmem>>, vector<1x1x2x128xf32>
      %362 = vector.shape_cast %361 : vector<1x1x2x128xf32> to vector<2x128xf32>
      %c0_309 = arith.constant 0 : index
      %c9_310 = arith.constant 9 : index
      %c0_311 = arith.constant 0 : index
      %c0_312 = arith.constant 0 : index
      %363 = vector.load %arg8[%c0_309, %c9_310, %c0_311, %c0_312] : memref<2x12x2x128xf32, #tpu.memory_space<vmem>>, vector<1x1x2x128xf32>
      %364 = vector.shape_cast %363 : vector<1x1x2x128xf32> to vector<2x128xf32>
      %cst_313 = arith.constant 1.000000e+00 : f32
      %365 = vector.broadcast %cst_313 : f32 to vector<2x128xf32>
      %366 = arith.subf %360, %365 : vector<2x128xf32>
      %367 = arith.mulf %322, %366 : vector<2x128xf32>
      %cst_314 = arith.constant 1.000000e+00 : f32
      %368 = vector.broadcast %cst_314 : f32 to vector<2x128xf32>
      %369 = arith.addf %367, %368 : vector<2x128xf32>
      %cst_315 = arith.constant 1.000000e-03 : f32
      %370 = vector.broadcast %cst_315 : f32 to vector<2x128xf32>
      %371 = arith.maximumf %369, %370 : vector<2x128xf32>
      %372 = arith.mulf %366, %323 : vector<2x128xf32>
      %373 = arith.subf %360, %372 : vector<2x128xf32>
      %374 = math.sqrt %373 : vector<2x128xf32>
      %375 = arith.mulf %366, %324 : vector<2x128xf32>
      %376 = arith.subf %360, %375 : vector<2x128xf32>
      %377 = math.sqrt %376 : vector<2x128xf32>
      %378 = arith.mulf %362, %291 : vector<2x128xf32>
      %379 = arith.addf %289, %378 : vector<2x128xf32>
      %380 = arith.mulf %371, %371 : vector<2x128xf32>
      %381 = arith.addf %311, %374 : vector<2x128xf32>
      %382 = arith.mulf %380, %381 : vector<2x128xf32>
      %383 = arith.addf %318, %377 : vector<2x128xf32>
      %384 = arith.mulf %382, %383 : vector<2x128xf32>
      %385 = tpu.reciprocal %384 {approx = true} : vector<2x128xf32> -> vector<2x128xf32>
      %386 = arith.mulf %379, %360 : vector<2x128xf32>
      %cst_316 = arith.constant 0.318309873 : f32
      %387 = vector.broadcast %cst_316 : f32 to vector<2x128xf32>
      %388 = arith.mulf %386, %387 : vector<2x128xf32>
      %389 = arith.mulf %388, %385 : vector<2x128xf32>
      %390 = arith.addf %364, %389 : vector<2x128xf32>
      %391 = arith.mulf %390, %321 : vector<2x128xf32>
      %392 = vector.broadcast %250 : f32 to vector<2x128xf32>
      %393 = arith.mulf %391, %392 : vector<2x128xf32>
      %cst_317 = arith.constant 1.000000e-01 : f32
      %394 = vector.broadcast %cst_317 : f32 to vector<2x128xf32>
      %395 = arith.addf %393, %394 : vector<2x128xf32>
      %c1_318 = arith.constant 1 : index
      %c3_319 = arith.constant 3 : index
      %c0_320 = arith.constant 0 : index
      %c0_321 = arith.constant 0 : index
      %396 = vector.load %arg8[%c1_318, %c3_319, %c0_320, %c0_321] : memref<2x12x2x128xf32, #tpu.memory_space<vmem>>, vector<1x1x2x128xf32>
      %397 = vector.shape_cast %396 : vector<1x1x2x128xf32> to vector<2x128xf32>
      %c1_322 = arith.constant 1 : index
      %c6_323 = arith.constant 6 : index
      %c0_324 = arith.constant 0 : index
      %c0_325 = arith.constant 0 : index
      %398 = vector.load %arg8[%c1_322, %c6_323, %c0_324, %c0_325] : memref<2x12x2x128xf32, #tpu.memory_space<vmem>>, vector<1x1x2x128xf32>
      %399 = vector.shape_cast %398 : vector<1x1x2x128xf32> to vector<2x128xf32>
      %c1_326 = arith.constant 1 : index
      %c9_327 = arith.constant 9 : index
      %c0_328 = arith.constant 0 : index
      %c0_329 = arith.constant 0 : index
      %400 = vector.load %arg8[%c1_326, %c9_327, %c0_328, %c0_329] : memref<2x12x2x128xf32, #tpu.memory_space<vmem>>, vector<1x1x2x128xf32>
      %401 = vector.shape_cast %400 : vector<1x1x2x128xf32> to vector<2x128xf32>
      %cst_330 = arith.constant 1.000000e+00 : f32
      %402 = vector.broadcast %cst_330 : f32 to vector<2x128xf32>
      %403 = arith.subf %397, %402 : vector<2x128xf32>
      %404 = arith.mulf %355, %403 : vector<2x128xf32>
      %cst_331 = arith.constant 1.000000e+00 : f32
      %405 = vector.broadcast %cst_331 : f32 to vector<2x128xf32>
      %406 = arith.addf %404, %405 : vector<2x128xf32>
      %cst_332 = arith.constant 1.000000e-03 : f32
      %407 = vector.broadcast %cst_332 : f32 to vector<2x128xf32>
      %408 = arith.maximumf %406, %407 : vector<2x128xf32>
      %409 = arith.mulf %403, %356 : vector<2x128xf32>
      %410 = arith.subf %397, %409 : vector<2x128xf32>
      %411 = math.sqrt %410 : vector<2x128xf32>
      %412 = arith.mulf %403, %357 : vector<2x128xf32>
      %413 = arith.subf %397, %412 : vector<2x128xf32>
      %414 = math.sqrt %413 : vector<2x128xf32>
      %415 = arith.mulf %399, %291 : vector<2x128xf32>
      %416 = arith.addf %289, %415 : vector<2x128xf32>
      %417 = arith.mulf %408, %408 : vector<2x128xf32>
      %418 = arith.addf %344, %411 : vector<2x128xf32>
      %419 = arith.mulf %417, %418 : vector<2x128xf32>
      %420 = arith.addf %351, %414 : vector<2x128xf32>
      %421 = arith.mulf %419, %420 : vector<2x128xf32>
      %422 = tpu.reciprocal %421 {approx = true} : vector<2x128xf32> -> vector<2x128xf32>
      %423 = arith.mulf %416, %397 : vector<2x128xf32>
      %cst_333 = arith.constant 0.318309873 : f32
      %424 = vector.broadcast %cst_333 : f32 to vector<2x128xf32>
      %425 = arith.mulf %423, %424 : vector<2x128xf32>
      %426 = arith.mulf %425, %422 : vector<2x128xf32>
      %427 = arith.addf %401, %426 : vector<2x128xf32>
      %428 = arith.mulf %427, %354 : vector<2x128xf32>
      %429 = vector.broadcast %250 : f32 to vector<2x128xf32>
      %430 = arith.mulf %428, %429 : vector<2x128xf32>
      %cst_334 = arith.constant 1.000000e-01 : f32
      %431 = vector.broadcast %cst_334 : f32 to vector<2x128xf32>
      %432 = arith.addf %430, %431 : vector<2x128xf32>
      %433 = math.log %395 : vector<2x128xf32>
      %434 = math.log %432 : vector<2x128xf32>
      %435 = arith.subf %433, %434 : vector<2x128xf32>
      %436 = math.absf %435 : vector<2x128xf32>
      %437 = arith.addf %358, %436 : vector<2x128xf32>
      %c0_335 = arith.constant 0 : index
      %c4_336 = arith.constant 4 : index
      %c0_337 = arith.constant 0 : index
      %c0_338 = arith.constant 0 : index
      %438 = vector.load %arg8[%c0_335, %c4_336, %c0_337, %c0_338] : memref<2x12x2x128xf32, #tpu.memory_space<vmem>>, vector<1x1x2x128xf32>
      %439 = vector.shape_cast %438 : vector<1x1x2x128xf32> to vector<2x128xf32>
      %c0_339 = arith.constant 0 : index
      %c7_340 = arith.constant 7 : index
      %c0_341 = arith.constant 0 : index
      %c0_342 = arith.constant 0 : index
      %440 = vector.load %arg8[%c0_339, %c7_340, %c0_341, %c0_342] : memref<2x12x2x128xf32, #tpu.memory_space<vmem>>, vector<1x1x2x128xf32>
      %441 = vector.shape_cast %440 : vector<1x1x2x128xf32> to vector<2x128xf32>
      %c0_343 = arith.constant 0 : index
      %c10_344 = arith.constant 10 : index
      %c0_345 = arith.constant 0 : index
      %c0_346 = arith.constant 0 : index
      %442 = vector.load %arg8[%c0_343, %c10_344, %c0_345, %c0_346] : memref<2x12x2x128xf32, #tpu.memory_space<vmem>>, vector<1x1x2x128xf32>
      %443 = vector.shape_cast %442 : vector<1x1x2x128xf32> to vector<2x128xf32>
      %cst_347 = arith.constant 1.000000e+00 : f32
      %444 = vector.broadcast %cst_347 : f32 to vector<2x128xf32>
      %445 = arith.subf %439, %444 : vector<2x128xf32>
      %446 = arith.mulf %322, %445 : vector<2x128xf32>
      %cst_348 = arith.constant 1.000000e+00 : f32
      %447 = vector.broadcast %cst_348 : f32 to vector<2x128xf32>
      %448 = arith.addf %446, %447 : vector<2x128xf32>
      %cst_349 = arith.constant 1.000000e-03 : f32
      %449 = vector.broadcast %cst_349 : f32 to vector<2x128xf32>
      %450 = arith.maximumf %448, %449 : vector<2x128xf32>
      %451 = arith.mulf %445, %323 : vector<2x128xf32>
      %452 = arith.subf %439, %451 : vector<2x128xf32>
      %453 = math.sqrt %452 : vector<2x128xf32>
      %454 = arith.mulf %445, %324 : vector<2x128xf32>
      %455 = arith.subf %439, %454 : vector<2x128xf32>
      %456 = math.sqrt %455 : vector<2x128xf32>
      %457 = arith.mulf %441, %291 : vector<2x128xf32>
      %458 = arith.addf %289, %457 : vector<2x128xf32>
      %459 = arith.mulf %450, %450 : vector<2x128xf32>
      %460 = arith.addf %311, %453 : vector<2x128xf32>
      %461 = arith.mulf %459, %460 : vector<2x128xf32>
      %462 = arith.addf %318, %456 : vector<2x128xf32>
      %463 = arith.mulf %461, %462 : vector<2x128xf32>
      %464 = tpu.reciprocal %463 {approx = true} : vector<2x128xf32> -> vector<2x128xf32>
      %465 = arith.mulf %458, %439 : vector<2x128xf32>
      %cst_350 = arith.constant 0.318309873 : f32
      %466 = vector.broadcast %cst_350 : f32 to vector<2x128xf32>
      %467 = arith.mulf %465, %466 : vector<2x128xf32>
      %468 = arith.mulf %467, %464 : vector<2x128xf32>
      %469 = arith.addf %443, %468 : vector<2x128xf32>
      %470 = arith.mulf %469, %321 : vector<2x128xf32>
      %471 = vector.broadcast %253 : f32 to vector<2x128xf32>
      %472 = arith.mulf %470, %471 : vector<2x128xf32>
      %cst_351 = arith.constant 1.000000e-01 : f32
      %473 = vector.broadcast %cst_351 : f32 to vector<2x128xf32>
      %474 = arith.addf %472, %473 : vector<2x128xf32>
      %c1_352 = arith.constant 1 : index
      %c4_353 = arith.constant 4 : index
      %c0_354 = arith.constant 0 : index
      %c0_355 = arith.constant 0 : index
      %475 = vector.load %arg8[%c1_352, %c4_353, %c0_354, %c0_355] : memref<2x12x2x128xf32, #tpu.memory_space<vmem>>, vector<1x1x2x128xf32>
      %476 = vector.shape_cast %475 : vector<1x1x2x128xf32> to vector<2x128xf32>
      %c1_356 = arith.constant 1 : index
      %c7_357 = arith.constant 7 : index
      %c0_358 = arith.constant 0 : index
      %c0_359 = arith.constant 0 : index
      %477 = vector.load %arg8[%c1_356, %c7_357, %c0_358, %c0_359] : memref<2x12x2x128xf32, #tpu.memory_space<vmem>>, vector<1x1x2x128xf32>
      %478 = vector.shape_cast %477 : vector<1x1x2x128xf32> to vector<2x128xf32>
      %c1_360 = arith.constant 1 : index
      %c10_361 = arith.constant 10 : index
      %c0_362 = arith.constant 0 : index
      %c0_363 = arith.constant 0 : index
      %479 = vector.load %arg8[%c1_360, %c10_361, %c0_362, %c0_363] : memref<2x12x2x128xf32, #tpu.memory_space<vmem>>, vector<1x1x2x128xf32>
      %480 = vector.shape_cast %479 : vector<1x1x2x128xf32> to vector<2x128xf32>
      %cst_364 = arith.constant 1.000000e+00 : f32
      %481 = vector.broadcast %cst_364 : f32 to vector<2x128xf32>
      %482 = arith.subf %476, %481 : vector<2x128xf32>
      %483 = arith.mulf %355, %482 : vector<2x128xf32>
      %cst_365 = arith.constant 1.000000e+00 : f32
      %484 = vector.broadcast %cst_365 : f32 to vector<2x128xf32>
      %485 = arith.addf %483, %484 : vector<2x128xf32>
      %cst_366 = arith.constant 1.000000e-03 : f32
      %486 = vector.broadcast %cst_366 : f32 to vector<2x128xf32>
      %487 = arith.maximumf %485, %486 : vector<2x128xf32>
      %488 = arith.mulf %482, %356 : vector<2x128xf32>
      %489 = arith.subf %476, %488 : vector<2x128xf32>
      %490 = math.sqrt %489 : vector<2x128xf32>
      %491 = arith.mulf %482, %357 : vector<2x128xf32>
      %492 = arith.subf %476, %491 : vector<2x128xf32>
      %493 = math.sqrt %492 : vector<2x128xf32>
      %494 = arith.mulf %478, %291 : vector<2x128xf32>
      %495 = arith.addf %289, %494 : vector<2x128xf32>
      %496 = arith.mulf %487, %487 : vector<2x128xf32>
      %497 = arith.addf %344, %490 : vector<2x128xf32>
      %498 = arith.mulf %496, %497 : vector<2x128xf32>
      %499 = arith.addf %351, %493 : vector<2x128xf32>
      %500 = arith.mulf %498, %499 : vector<2x128xf32>
      %501 = tpu.reciprocal %500 {approx = true} : vector<2x128xf32> -> vector<2x128xf32>
      %502 = arith.mulf %495, %476 : vector<2x128xf32>
      %cst_367 = arith.constant 0.318309873 : f32
      %503 = vector.broadcast %cst_367 : f32 to vector<2x128xf32>
      %504 = arith.mulf %502, %503 : vector<2x128xf32>
      %505 = arith.mulf %504, %501 : vector<2x128xf32>
      %506 = arith.addf %480, %505 : vector<2x128xf32>
      %507 = arith.mulf %506, %354 : vector<2x128xf32>
      %508 = vector.broadcast %253 : f32 to vector<2x128xf32>
      %509 = arith.mulf %507, %508 : vector<2x128xf32>
      %cst_368 = arith.constant 1.000000e-01 : f32
      %510 = vector.broadcast %cst_368 : f32 to vector<2x128xf32>
      %511 = arith.addf %509, %510 : vector<2x128xf32>
      %512 = math.log %474 : vector<2x128xf32>
      %513 = math.log %511 : vector<2x128xf32>
      %514 = arith.subf %512, %513 : vector<2x128xf32>
      %515 = math.absf %514 : vector<2x128xf32>
      %516 = arith.addf %437, %515 : vector<2x128xf32>
      %c0_369 = arith.constant 0 : index
      %c5_370 = arith.constant 5 : index
      %c0_371 = arith.constant 0 : index
      %c0_372 = arith.constant 0 : index
      %517 = vector.load %arg8[%c0_369, %c5_370, %c0_371, %c0_372] : memref<2x12x2x128xf32, #tpu.memory_space<vmem>>, vector<1x1x2x128xf32>
      %518 = vector.shape_cast %517 : vector<1x1x2x128xf32> to vector<2x128xf32>
      %c0_373 = arith.constant 0 : index
      %c8_374 = arith.constant 8 : index
      %c0_375 = arith.constant 0 : index
      %c0_376 = arith.constant 0 : index
      %519 = vector.load %arg8[%c0_373, %c8_374, %c0_375, %c0_376] : memref<2x12x2x128xf32, #tpu.memory_space<vmem>>, vector<1x1x2x128xf32>
      %520 = vector.shape_cast %519 : vector<1x1x2x128xf32> to vector<2x128xf32>
      %c0_377 = arith.constant 0 : index
      %c11_378 = arith.constant 11 : index
      %c0_379 = arith.constant 0 : index
      %c0_380 = arith.constant 0 : index
      %521 = vector.load %arg8[%c0_377, %c11_378, %c0_379, %c0_380] : memref<2x12x2x128xf32, #tpu.memory_space<vmem>>, vector<1x1x2x128xf32>
      %522 = vector.shape_cast %521 : vector<1x1x2x128xf32> to vector<2x128xf32>
      %cst_381 = arith.constant 1.000000e+00 : f32
      %523 = vector.broadcast %cst_381 : f32 to vector<2x128xf32>
      %524 = arith.subf %518, %523 : vector<2x128xf32>
      %525 = arith.mulf %322, %524 : vector<2x128xf32>
      %cst_382 = arith.constant 1.000000e+00 : f32
      %526 = vector.broadcast %cst_382 : f32 to vector<2x128xf32>
      %527 = arith.addf %525, %526 : vector<2x128xf32>
      %cst_383 = arith.constant 1.000000e-03 : f32
      %528 = vector.broadcast %cst_383 : f32 to vector<2x128xf32>
      %529 = arith.maximumf %527, %528 : vector<2x128xf32>
      %530 = arith.mulf %524, %323 : vector<2x128xf32>
      %531 = arith.subf %518, %530 : vector<2x128xf32>
      %532 = math.sqrt %531 : vector<2x128xf32>
      %533 = arith.mulf %524, %324 : vector<2x128xf32>
      %534 = arith.subf %518, %533 : vector<2x128xf32>
      %535 = math.sqrt %534 : vector<2x128xf32>
      %536 = arith.mulf %520, %291 : vector<2x128xf32>
      %537 = arith.addf %289, %536 : vector<2x128xf32>
      %538 = arith.mulf %529, %529 : vector<2x128xf32>
      %539 = arith.addf %311, %532 : vector<2x128xf32>
      %540 = arith.mulf %538, %539 : vector<2x128xf32>
      %541 = arith.addf %318, %535 : vector<2x128xf32>
      %542 = arith.mulf %540, %541 : vector<2x128xf32>
      %543 = tpu.reciprocal %542 {approx = true} : vector<2x128xf32> -> vector<2x128xf32>
      %544 = arith.mulf %537, %518 : vector<2x128xf32>
      %cst_384 = arith.constant 0.318309873 : f32
      %545 = vector.broadcast %cst_384 : f32 to vector<2x128xf32>
      %546 = arith.mulf %544, %545 : vector<2x128xf32>
      %547 = arith.mulf %546, %543 : vector<2x128xf32>
      %548 = arith.addf %522, %547 : vector<2x128xf32>
      %549 = arith.mulf %548, %321 : vector<2x128xf32>
      %550 = vector.broadcast %256 : f32 to vector<2x128xf32>
      %551 = arith.mulf %549, %550 : vector<2x128xf32>
      %cst_385 = arith.constant 1.000000e-01 : f32
      %552 = vector.broadcast %cst_385 : f32 to vector<2x128xf32>
      %553 = arith.addf %551, %552 : vector<2x128xf32>
      %c1_386 = arith.constant 1 : index
      %c5_387 = arith.constant 5 : index
      %c0_388 = arith.constant 0 : index
      %c0_389 = arith.constant 0 : index
      %554 = vector.load %arg8[%c1_386, %c5_387, %c0_388, %c0_389] : memref<2x12x2x128xf32, #tpu.memory_space<vmem>>, vector<1x1x2x128xf32>
      %555 = vector.shape_cast %554 : vector<1x1x2x128xf32> to vector<2x128xf32>
      %c1_390 = arith.constant 1 : index
      %c8_391 = arith.constant 8 : index
      %c0_392 = arith.constant 0 : index
      %c0_393 = arith.constant 0 : index
      %556 = vector.load %arg8[%c1_390, %c8_391, %c0_392, %c0_393] : memref<2x12x2x128xf32, #tpu.memory_space<vmem>>, vector<1x1x2x128xf32>
      %557 = vector.shape_cast %556 : vector<1x1x2x128xf32> to vector<2x128xf32>
      %c1_394 = arith.constant 1 : index
      %c11_395 = arith.constant 11 : index
      %c0_396 = arith.constant 0 : index
      %c0_397 = arith.constant 0 : index
      %558 = vector.load %arg8[%c1_394, %c11_395, %c0_396, %c0_397] : memref<2x12x2x128xf32, #tpu.memory_space<vmem>>, vector<1x1x2x128xf32>
      %559 = vector.shape_cast %558 : vector<1x1x2x128xf32> to vector<2x128xf32>
      %cst_398 = arith.constant 1.000000e+00 : f32
      %560 = vector.broadcast %cst_398 : f32 to vector<2x128xf32>
      %561 = arith.subf %555, %560 : vector<2x128xf32>
      %562 = arith.mulf %355, %561 : vector<2x128xf32>
      %cst_399 = arith.constant 1.000000e+00 : f32
      %563 = vector.broadcast %cst_399 : f32 to vector<2x128xf32>
      %564 = arith.addf %562, %563 : vector<2x128xf32>
      %cst_400 = arith.constant 1.000000e-03 : f32
      %565 = vector.broadcast %cst_400 : f32 to vector<2x128xf32>
      %566 = arith.maximumf %564, %565 : vector<2x128xf32>
      %567 = arith.mulf %561, %356 : vector<2x128xf32>
      %568 = arith.subf %555, %567 : vector<2x128xf32>
      %569 = math.sqrt %568 : vector<2x128xf32>
      %570 = arith.mulf %561, %357 : vector<2x128xf32>
      %571 = arith.subf %555, %570 : vector<2x128xf32>
      %572 = math.sqrt %571 : vector<2x128xf32>
      %573 = arith.mulf %557, %291 : vector<2x128xf32>
      %574 = arith.addf %289, %573 : vector<2x128xf32>
      %575 = arith.mulf %566, %566 : vector<2x128xf32>
      %576 = arith.addf %344, %569 : vector<2x128xf32>
      %577 = arith.mulf %575, %576 : vector<2x128xf32>
      %578 = arith.addf %351, %572 : vector<2x128xf32>
      %579 = arith.mulf %577, %578 : vector<2x128xf32>
      %580 = tpu.reciprocal %579 {approx = true} : vector<2x128xf32> -> vector<2x128xf32>
      %581 = arith.mulf %574, %555 : vector<2x128xf32>
      %cst_401 = arith.constant 0.318309873 : f32
      %582 = vector.broadcast %cst_401 : f32 to vector<2x128xf32>
      %583 = arith.mulf %581, %582 : vector<2x128xf32>
      %584 = arith.mulf %583, %580 : vector<2x128xf32>
      %585 = arith.addf %559, %584 : vector<2x128xf32>
      %586 = arith.mulf %585, %354 : vector<2x128xf32>
      %587 = vector.broadcast %256 : f32 to vector<2x128xf32>
      %588 = arith.mulf %586, %587 : vector<2x128xf32>
      %cst_402 = arith.constant 1.000000e-01 : f32
      %589 = vector.broadcast %cst_402 : f32 to vector<2x128xf32>
      %590 = arith.addf %588, %589 : vector<2x128xf32>
      %591 = math.log %553 : vector<2x128xf32>
      %592 = math.log %590 : vector<2x128xf32>
      %593 = arith.subf %591, %592 : vector<2x128xf32>
      %594 = math.absf %593 : vector<2x128xf32>
      %595 = arith.addf %516, %594 : vector<2x128xf32>
      %c0_403 = arith.constant 0 : index
      %c0_404 = arith.constant 0 : index
      %596 = vector.load %arg9[%c0_403, %c0_404] : memref<2x128xf32, #tpu.memory_space<vmem>>, vector<2x128xf32>
      tpu.vector_store %arg9[%c0_403, %c0_404], %595 {strides = array<i32>} : memref<2x128xf32, #tpu.memory_space<vmem>>, vector<2x128xf32>,
    }
    %c9_i32_222 = arith.constant 9 : i32
    %c0_223 = arith.constant 0 : index
    %c0_224 = arith.constant 0 : index
    %238 = vector.load %arg9[%c0_223, %c0_224] : memref<2x128xf32, #tpu.memory_space<vmem>>, vector<2x128xf32>
    %239 = vector.shape_cast %238 : vector<2x128xf32> to vector<1x2x128xf32>
    %cst_225 = arith.constant dense<0.000000e+00> : vector<1xf32>
    %240 = vector.multi_reduction <add>, %239, %cst_225 [1, 2] : vector<1x2x128xf32> to vector<1xf32>
    %241 = vector.shape_cast %240 : vector<1xf32> to vector<1x1x1xf32>
    %242 = vector.extract %241[0, 0, 0] : f32 from vector<1x1x1xf32>
    %243 = vector.broadcast %242 : f32 to vector<1x1x8x128xf32>
    %c0_226 = arith.constant 0 : index
    %c0_227 = arith.constant 0 : index
    %c0_228 = arith.constant 0 : index
    %c0_229 = arith.constant 0 : index
    %244 = vector.load %arg6[%c0_226, %c0_227, %c0_228, %c0_229] : memref<1x1x8x128xf32, #tpu.memory_space<vmem>>, vector<1x1x8x128xf32>
    tpu.vector_store %arg6[%c0_226, %c0_227, %c0_228, %c0_229], %243 {strides = array<i32>} : memref<1x1x8x128xf32, #tpu.memory_space<vmem>>, vector<1x1x8x128xf32>,
    return
  }
  func.func @transform_0(%arg0: i32, %arg1: i32) -> i32 {
    %c0_i32 = arith.constant 0 : i32
    %c0_i32_0 = arith.constant 0 : i32
    return %c0_i32 : i32
  }
  func.func @transform_1(%arg0: i32, %arg1: i32) -> (i32, i32, i32) {
    %c0_i32 = arith.constant 0 : i32
    %c0_i32_0 = arith.constant 0 : i32
    %c0_i32_1 = arith.constant 0 : i32
    return %c0_i32, %arg0, %c0_i32_0 : i32, i32, i32
  }
  func.func @transform_2(%arg0: i32, %arg1: i32) -> (i32, i32, i32, i32) {
    %c0_i32 = arith.constant 0 : i32
    %c0_i32_0 = arith.constant 0 : i32
    %c0_i32_1 = arith.constant 0 : i32
    return %arg1, %c0_i32, %arg0, %c0_i32_0 : i32, i32, i32, i32
  }
  func.func @transform_3(%arg0: i32, %arg1: i32) -> (i32, i32, i32, i32) {
    %c0_i32 = arith.constant 0 : i32
    %c0_i32_0 = arith.constant 0 : i32
    %c0_i32_1 = arith.constant 0 : i32
    return %arg1, %c0_i32, %arg0, %c0_i32_0 : i32, i32, i32, i32
  }
  func.func @transform_4(%arg0: i32, %arg1: i32) -> (i32, i32, i32, i32) {
    %c0_i32 = arith.constant 0 : i32
    %c0_i32_0 = arith.constant 0 : i32
    %c0_i32_1 = arith.constant 0 : i32
    return %arg0, %arg1, %c0_i32, %c0_i32_0 : i32, i32, i32, i32
  }
}

</mosaic_0001>

<bundles_post_ra>
// kernel: tpu_custom_call.1
= control target key start
LH: loop header
LB: loop body
LE: loop exit
PB: predicated region body
PF: predicated region fallthrough
CT: control target
= control target key end

     0   :  { %s2426_s0 = inlined_call_operand.hbm [shape: f32[81], index: 0, kind: input, shape index: {}]   ;;  %s2427_s1 = inlined_call_operand.hbm [shape: f32[2,2,128], index: 1, kind: input, shape index: {}]   ;;  %s2428_s2 = inlined_call_operand.hbm [shape: f32[2,12,2,128], index: 2, kind: input, shape index: {}]   ;;  %s2429_s3 = inlined_call_operand.hbm [shape: f32[2,12,2,128], index: 3, kind: input, shape index: {}]   ;;  %s2430_s4 = inlined_call_operand.hbm [shape: f32[1,2,8,128], index: 4, kind: output, shape index: {}]  }
   0x1   :  { %2436 = sst [smem:[#allocation19_spill]] %s2426_s0 }
   0x2   :  { %2437 = sst [smem:[#allocation20_spill]] %s2427_s1 }
   0x3   :  { %2438 = sst [smem:[#allocation21_spill]] %s2428_s2 }
   0x4   :  { %9 = vsyncpa [#allocation8], 0 }
   0x5   :  { %10 = vsyncpa [#allocation6], 0 }
   0x6   :  { %11 = vsyncpa [#allocation11], 0 }
   0x7   :  { %13 = vsyncpa [#allocation11 + $0x1], 0 }
   0x8   :  { %14 = vsyncpa [#allocation7], 0 }
   0x9   :  { %16 = vsyncpa [#allocation7 + $0x1], 0  ;;  %s1789_s15 = smov 0   ;;  %s1791_s16 = smov 0  }
   0xa   :  { %s1793_s17 = smov 0   ;;  %s1795_s18 = smov 0  }
   0xb   :  { %s1797_s19 = smov 0   ;;  %s1799_s20 = smov 0  }
   0xc LB: > { %s31_s21 = sadd.s32 1, %s1745_s19  ;;  %s90_s22 = sadd.s32 1, %s1737_s17  ;;  %s1749_s20 = sphi %s1799_s20, %s22_s20   ;;  %s1745_s19 = sphi %s1797_s19, %s2455_s19   ;;  %s1741_s18 = sphi %s1795_s18, %s2454_s18   ;;  %s1737_s17 = sphi %s1793_s17, %s2453_s17   ;;  %s1733_s16 = sphi %s1791_s16, %s2452_s16   ;;  %s1729_s15 = sphi %s1789_s15, %s2451_s15  }
   0xd   : > { %p32_p0 = scmp.ge.s32.totalorder %s31_s21, 2  ;;  %p97_p1 = scmp.ne.s32.totalorder %s1737_s17, %s1733_s16 }
   0xe   : > { %p98_p2 = scmp.eq.s32.totalorder %s1749_s20, 0  ;;  %p1308_p4 = scmp.ge.s32.totalorder %s1749_s20, 2 }
   0xf   : > { %s2457_s21 = smov (%p32_p0, %s31_s21), 0  ;;  %p1415_p6 = scmp.lt.s32.totalorder %s1749_s20, 2 }
  0x10   : > { %2439 = sst [smem:[#allocation18_spill]] %s2457_s21  ;;  %p99_p3 = por %p98_p2, %p97_p1 }
  0x11   : > { %s85_s23 = ssub.s32 %s1745_s19, %s2457_s21  ;;  %s209_s24 = sand.u32 1, %s1749_s20  }
  0x12   : > { %p88_p5 = scmp.eq.s32.totalorder %s85_s23, 0  ;;  %s211_s25 = sand.u32 1, %s1737_s17  }
  0x13   : > { %s1838_s27 = smul.u32 24, %s211_s25  ;;  %p1841_p7 = pnand %p1415_p6, %p99_p3 }
  0x14   : > { %s1836_s26 = scalar_select %p88_p5, %s1737_s17, %s90_s22  }
  0x15   : > { %s1375_s28 = smul.u32 24, %s1745_s19  ;;  %s2441_s2 = sld [smem:[#allocation21_spill]] }
  0x16   : > { %s213_s7 = scalar_lea.vmem [#allocation10], %s1838_s27  ;;  %s1851_s10 = scalar_lea.sflag [#allocation11], %s209_s24 }
  0x17   : > { %s222_s8 = sshll.u32 %s213_s7, 4  ;;  %s2431_s11 = smov 32   ;;  %s223_s8 = int_to_ptr.vmem [resolvable:$true] %s222_s8 }
  0x18   : > { %s2433_s12 = smov 2   ;;  %s1860_s13 = sadd.s32 4294967295, %s1749_s20  }
  0x19   : > { %s1304_s14 = sadd.s32 4294967294, %s1749_s20   ;;  %p103_p8 = scmp.ne.s32.totalorder %s1733_s16, %s1729_s15 }
  0x1a   : > { %p104_p9 = scmp.eq.s32.totalorder %s1860_s13, 0  ;;  %p157_p10 = scmp.eq.s32.totalorder %s1860_s13, 1 }
  0x1b   : > { %s219_s6 = scalar_lea.hbm %s2441_s2, %s1375_s28  ;;  %p163_p11 = scmp.eq.s32.totalorder %s1304_s14, 1 }
  0x1c   : > { %s220_s9 = sshll.u32 %s219_s6, 4  ;;  %p1305_p12 = scmp.ge.s32.totalorder %s1749_s20, 1  ;;  %s221_s9 = int_to_ptr.hbm [resolvable:$true] %s220_s9 }
  0x1d   : > { %1405 = dma.hbm_to_vmem [thread:$0]  (!%p1841_p7), %s221_s9, 384, %s223_s8, %s1851_s10, %s2431_s11, %s2431_s11, %s2433_s12  }
  0x1e   : > { %p1870_p13 = por %p104_p9, %p103_p8  ;;  %p1877_p0 = por %p157_p10, %p97_p1 }
  0x1f   : > { %p1881_p2 = por %p163_p11, %p103_p8  ;;  %p170_p3 = scmp.lt.s32.totalorder %s1749_s20, 3 }
  0x20   : > { %s2445_s0 = sld [smem:[#allocation19_spill]]  ;;  %s1761_s14 = smov [#allocation9]  }
  0x21   : > { %p1889_p5 = pnand %p1305_p12, %p170_p3  ;;  %s2447_s1 = sld [smem:[#allocation20_spill]] }
  0x22   : > { %s195_s25 = sshll.u32 %s1761_s14, 4  ;;  %s242_s12 = scalar_lea.hbm %s2429_s3, %s1375_s28  ;;  %s196_s25 = int_to_ptr.vmem [resolvable:$true] %s195_s25 }
  0x23   : > { %p1395_p1 = pneg %p1889_p5  ;;  %s1762_s2 = smov [#allocation5]  }
  0x24   : > { %s2448_s7 = smov 2   ;;  %s2449_s8 = smov 32  }
  0x25   : > { %p1396_p6 = pnand %p1395_p1, %p104_p9 }
  0x26   : > { %s182_s5 = sshll.u32 %s2445_s0, 4  ;;  %s243_s0 = sshll.u32 %s242_s12, 4  ;;  %s183_s5 = int_to_ptr.hbm [resolvable:$true] %s182_s5  ;;  %s244_s0 = int_to_ptr.hbm [resolvable:$true] %s243_s0 }
  0x27   : > { %s193_s9 = sshll.u32 %s2447_s1, 4  ;;  %s236_s1 = scalar_lea.vmem [#allocation12], %s1838_s27  ;;  %s194_s9 = int_to_ptr.hbm [resolvable:$true] %s193_s9 }
  0x28   : > { %1398 = dma.hbm_to_smem (!%p1396_p6), %s183_s5, 16, %s1762_s2, [#allocation8]  }
  0x29   : > { %1401 = dma.hbm_to_vmem [thread:$0]  (!%p1396_p6), %s194_s9, 64, %s196_s25, [#allocation6], %s2449_s8, %s2449_s8, %s2448_s7  }
  0x2a   : > { %s245_s21 = sshll.u32 %s236_s1, 4  ;;  %257 = sbr.rel (%p1889_p5) target bundleno = 512 (0x200), region = 36  ;;  %s246_s21 = int_to_ptr.vmem [resolvable:$true] %s245_s21 }
  0x2b   : > { %1408 = dma.hbm_to_vmem [thread:$0]  (!%p1841_p7), %s244_s0, 384, %s246_s21, %s1851_s10, %s2449_s8, %s2449_s8, %s2448_s7  }
  0x2f   : > { %1712 = dma.done.wait (%p104_p9), [#allocation8], 16  }
  0x30   : > { %1714 = vsyncadd (%p104_p9), [#allocation8], 4294967280 }
  0x31   : > { %1716 = dma.done.wait (%p104_p9), [#allocation6], 64  }
  0x32   : > { %1718 = vsyncadd (%p104_p9), [#allocation6], 4294967232  ;;  %s269_s1 = sand.u32 1, %s1860_s13   ;;  %s1927_s0 = sand.u32 1, %s1733_s16  }
  0x33   : > { %s1378_s2 = smul.u32 24, %s1927_s0  ;;  %s270_s21 = scalar_lea.sflag [#allocation11], %s269_s1 }
  0x35   : > { %s1930_s27 = scalar_lea.vmem [#allocation10], %s1378_s2 }
  0x36   : > { %1720 = dma.done.wait (%p1870_p13), %s270_s21, 768  }
  0x37   : > { %1722 = vsyncadd (%p1870_p13), %s270_s21, 4294966528  ;;  %s1936_s28 = scalar_lea.vmem [#allocation12], %s1378_s2 }
  0x38   : > { %289 = sfence }
  0x39   : > { %s1314_s29 = sshll.u32 %s1927_s0, 3  ;;  %p1315_p7 = scmp.ne.s32.totalorder %s1741_s18, 0 }
  0x3a   : > { %s1939_s10 = scalar_lea.vmem [#allocation13], %s1314_s29  ;;  %s1946_s11 = smov (!%p1315_p7), 0  }
  0x3b   : > { %318 = sbr.rel (%p1315_p7) target bundleno = 155 (0x9b), region = 56 }
  0x40   : > { %v1942_v0 = vld [vmem:[#allocation9] sm:$0x3]  ;;  %v1944_v1 = vld [vmem:[#allocation9 + $0x2] sm:$0x3] }
  0x41 LB: >> { %s328_s12 = smul.u32 9, %s1753_s11  ;;  %s1753_s11 = sphi %s1946_s11, %s327_s11  }
  0x42   : >> { %s423_s29 = smul.u32 22, %s1753_s11  ;;  %s327_s11 = sadd.s32 1, %s1753_s11  }
  0x43   : >> { %s329_s13 = sld [smem:[#allocation5 + %s328_s12]]  ;;  %s330_s22 = sadd.s32 1, %s328_s12 }
  0x44   : >> { %s331_s5 = sld [smem:[#allocation5 + %s330_s22]]  ;;  %s332_s6 = sadd.s32 2, %s328_s12 }
  0x45   : >> { %s1952_s9 = sld [smem:[#allocation5 + %s332_s6]]  ;;  %s334_s14 = sadd.s32 3, %s328_s12 }
  0x46   : >> { %s336_s25 = sadd.s32 4, %s328_s12  ;;  %s335_s30 = sld [smem:[#allocation5 + %s334_s14]] }
  0x47   : >> { %s338_s7 = sadd.s32 5, %s328_s12  ;;  %s337_s8 = sld [smem:[#allocation5 + %s336_s25]] }
  0x48   : >> { %s1954_s1 = sld [smem:[#allocation5 + %s338_s7]]  ;;  %s1967_s12 = scalar_lea.vmem [#allocation2], %s423_s29 }
  0x49   : >> { %v340_v2 = vstv %s329_s13  ;;  %p324_p8 = scmp.ge.s32.totalorder %s327_s11, 9  }
  0x4a   : >> { %v341_v3 = vsub.f32 %v340_v2, %v1942_v0  ;;  %v342_v4 = vstv %s331_s5 }
  0x4b   : >> { %v343_v5 = vsub.f32 %v342_v4, %v1944_v1  ;;  %s347_s2 = smul.f32 %s1952_s9, %s1952_s9  ;;  %v363_v33 = vstv %s1952_s9 }
  0x4c   : >> { %v344_v6 = vmul.f32 %v341_v3, %v341_v3  ;;  %v365_v8 = vstv %s335_s30 }
  0x4d   : >> { %v345_v7 = vmul.f32 %v343_v5, %v343_v5  ;;  %v348_v9 = vstv %s347_s2  ;;  %v366_v10 = vsub.f32 %v365_v8, %v1942_v0  ;;  %v367_v11 = vstv %s337_s8 }
  0x4e   : >> { %v368_v13 = vsub.f32 %v367_v11, %v1944_v1  ;;  %s372_s21 = smul.f32 %s1954_s1, %s1954_s1  ;;  %v389_v38 = vstv %s1954_s1 }
  0x4f   : >> { %v346_v12 = vadd.f32 %v345_v7, %v344_v6  ;;  %v369_v14 = vmul.f32 %v366_v10, %v366_v10 }
  0x50   : >> { %v370_v16 = vmul.f32 %v368_v13, %v368_v13  ;;  %v373_v17 = vstv %s372_s21 }
  0x51   : >> { %v349_v15 = vadd.f32 %v348_v9, %v346_v12 }
  0x52   : >> { %v371_v19 = vadd.f32 %v370_v16, %v369_v14 }
  0x53   : >> { %v350_v18 = vmax.f32 %v349_v15, 1e-12 }
  0x54   : >> { %v374_v20 = vadd.f32 %v373_v17, %v371_v19 }
  0x55   : >> { %1488 = vrsqrt.f32 %v350_v18  ;;  %vm357_vm0 = vweird.f32 %v350_v18 }
  0x56   : >> { %v375_v21 = vmax.f32 %v374_v20, 1e-12 }
  0x58   : >> { %1490 = vrsqrt.f32 %v375_v21  ;;  %vm382_vm3 = vweird.f32 %v375_v21 }
  0x5b   : >> { %v1489_v22 = vpop.eup %1488 }
  0x5c   : >> { %v352_v23 = vmul.f32 %v1489_v22, %v350_v18  ;;  %vm358_vm1 = vweird.f32 %v1489_v22 }
  0x5d   : >> { %vm359_vm2 = vmor %vm357_vm0, %vm358_vm1 }
  0x5e   : >> { %v353_v24 = vmul.f32 %v1489_v22, %v352_v23  ;;  %v1491_v25 = vpop.eup %1490 }
  0x5f   : >> { %v377_v27 = vmul.f32 %v1491_v25, %v375_v21  ;;  %vm383_vm4 = vweird.f32 %v1491_v25 }
  0x60   : >> { %v354_v26 = vmul.f32 0.5, %v353_v24  ;;  %vm384_vm5 = vmor %vm382_vm3, %vm383_vm4 }
  0x61   : >> { %v378_v29 = vmul.f32 %v1491_v25, %v377_v27 }
  0x62   : >> { %v355_v28 = vsub.f32 1.5, %v354_v26 }
  0x63   : >> { %v379_v31 = vmul.f32 0.5, %v378_v29 }
  0x64   : >> { %v356_v30 = vmul.f32 %v1489_v22, %v355_v28 }
  0x65   : >> { %v380_v34 = vsub.f32 1.5, %v379_v31 }
  0x66   : >> { %v360_v32 = vsel %vm359_vm2, %v1489_v22, %v356_v30 }
  0x67   : >> { %v361_v35 = vmul.f32 %v360_v32, %v341_v3  ;;  %v362_v36 = vmul.f32 %v360_v32, %v343_v5  ;;  %v381_v37 = vmul.f32 %v1491_v25, %v380_v34  ;;  %v364_v39 = vmul.f32 %v363_v33, %v360_v32 }
  0x69   : >> { %425 = vst [vmem:[%s1967_s12] sm:$0x3] %v361_v35  ;;  %v385_v40 = vsel %vm384_vm5, %v1491_v25, %v381_v37 }
  0x6a   : >> { %1316 = vst [vmem:[%s1967_s12 + $0x2] sm:$0x3] %v362_v36  ;;  %v387_v41 = vmul.f32 %v385_v40, %v366_v10  ;;  %v388_v42 = vmul.f32 %v385_v40, %v368_v13  ;;  %v390_v43 = vmul.f32 %v389_v38, %v385_v40  ;;  %v386_v47 = vmul.f32 %v385_v40, %v385_v40 }
  0x6b   : >> { %1317 = vst [vmem:[%s1967_s12 + $0x4] sm:$0x3] %v364_v39 }
  0x6c   : >> { %1318 = vst [vmem:[%s1967_s12 + $0x6] sm:$0x3] %v387_v41  ;;  %v392_v44 = vadd.f32 %v388_v42, %v362_v36  ;;  %v393_v45 = vadd.f32 %v390_v43, %v364_v39  ;;  %v391_v46 = vadd.f32 %v387_v41, %v361_v35 }
  0x6d   : >> { %1319 = vst [vmem:[%s1967_s12 + $0x8] sm:$0x3] %v388_v42 }
  0x6e   : >> { %v395_v48 = vmul.f32 %v392_v44, %v392_v44  ;;  %v397_v49 = vmul.f32 %v393_v45, %v393_v45  ;;  %1320 = vst [vmem:[%s1967_s12 + $0xa] sm:$0x3] %v390_v43  ;;  %v394_v50 = vmul.f32 %v391_v46, %v391_v46 }
  0x6f   : >> { %1324 = vst [vmem:[%s1967_s12 + $0x12] sm:$0x3] %v386_v47 }
  0x70   : >> { %v396_v51 = vadd.f32 %v395_v48, %v394_v50 }
  0x72   : >> { %v398_v52 = vadd.f32 %v397_v49, %v396_v51 }
  0x74   : >> { %v399_v53 = vmax.f32 %v398_v52, 1e-12 }
  0x76   : >> { %1492 = vrsqrt.f32 %v399_v53  ;;  %vm406_vm6 = vweird.f32 %v399_v53 }
  0x7c   : >> { %v1493_v54 = vpop.eup %1492 }
  0x7d   : >> { %v401_v55 = vmul.f32 %v1493_v54, %v399_v53  ;;  %vm407_vm7 = vweird.f32 %v1493_v54 }
  0x7e   : >> { %vm408_vm8 = vmor %vm406_vm6, %vm407_vm7 }
  0x7f   : >> { %v402_v56 = vmul.f32 %v1493_v54, %v401_v55 }
  0x81   : >> { %v403_v57 = vmul.f32 0.5, %v402_v56 }
  0x83   : >> { %v404_v58 = vsub.f32 1.5, %v403_v57 }
  0x85   : >> { %v405_v59 = vmul.f32 %v1493_v54, %v404_v58 }
  0x87   : >> { %v409_v60 = vsel %vm408_vm8, %v1493_v54, %v405_v59 }
  0x88   : >> { %v410_v61 = vmul.f32 %v409_v60, %v391_v46  ;;  %v411_v62 = vmul.f32 %v409_v60, %v392_v44  ;;  %v412_v63 = vmul.f32 %v409_v60, %v393_v45 }
  0x8a   : >> { %v413_v2 = vmul.f32 %v410_v61, %v361_v35  ;;  %1321 = vst [vmem:[%s1967_s12 + $0xc] sm:$0x3] %v410_v61  ;;  %v414_v3 = vmul.f32 %v411_v62, %v362_v36  ;;  %v416_v4 = vmul.f32 %v412_v63, %v364_v39 }
  0x8b   : >> { %1322 = vst [vmem:[%s1967_s12 + $0xe] sm:$0x3] %v411_v62 }
  0x8c   : >> { %v415_v5 = vadd.f32 %v414_v3, %v413_v2  ;;  %1323 = vst [vmem:[%s1967_s12 + $0x10] sm:$0x3] %v412_v63 }
  0x8e   : >> { %v417_v6 = vadd.f32 %v416_v4, %v415_v5 }
  0x90   : >> { %v418_v7 = vmax.f32 %v417_v6, 0.001 }
  0x92   : >> { %v419_v8 = vsub.f32 1.0, %v418_v7 }
  0x94   : >> { %v420_v9 = vmul.f32 %v419_v8, %v419_v8 }
  0x96   : >> { %v421_v10 = vmul.f32 %v420_v9, %v420_v9  ;;  %326 = sbr.rel (!%p324_p8) target bundleno = 65 (0x41), region = 189 }
  0x98   : >> { %v422_v11 = vmul.f32 %v421_v10, %v419_v8 }
  0x9a   : >> { %1325 = vst [vmem:[%s1967_s12 + $0x14] sm:$0x3] %v422_v11 }
  0x9b PF: > { %v456_v12 = vld [vmem:[%s1930_s27] sm:$0x3]  ;;  %v1327_v13 = vld [vmem:[%s1930_s27 + $0x2] sm:$0x3]  ;;  %v1329_v14 = vld [vmem:[%s1930_s27 + $0x4] sm:$0x3] }
  0x9c   : > { %v457_v15 = vmul.f32 2.0, %v456_v12  ;;  %v461_v16 = vmul.f32 2.0, %v1327_v13  ;;  %v465_v17 = vmul.f32 2.0, %v1329_v14  ;;  %v1332_v18 = vld [vmem:[%s1930_s27 + $0xc] sm:$0x3] }
  0x9d   : > { %v495_v19 = vmax.f32 %v1332_v18, 0.001  ;;  %v1333_v20 = vld [vmem:[%s1930_s27 + $0x12] sm:$0x3]  ;;  %v1331_v0 = vld [vmem:[%s1930_s27 + $0x6] sm:$0x3] }
  0x9e   : > { %v1989_v1 = vadd.f32 -1.0, %v457_v15  ;;  %v1991_v21 = vadd.f32 -1.0, %v461_v16  ;;  %v1993_v22 = vadd.f32 -1.0, %v465_v17  ;;  %504 = vst [vmem:[#allocation3 + $0xc] sm:$0x3] %v1333_v20  ;;  %v505_v23 = vsub.f32 1.0, %v1333_v20 }
  0x9f   : > { %v496_v24 = vmin.f32 %v495_v19, 1.0  ;;  %v1335_v25 = vld [vmem:[%s1930_s27 + $0xe] sm:$0x3]  ;;  %v1336_v26 = vld [vmem:[%s1930_s27 + $0x14] sm:$0x3] }
  0xa0   : > { %v467_v27 = vmul.f32 %v1989_v1, %v1989_v1  ;;  %v468_v28 = vmul.f32 %v1991_v21, %v1991_v21  ;;  %v470_v29 = vmul.f32 %v1993_v22, %v1993_v22  ;;  %v506_v30 = vmul.f32 %v1331_v0, %v505_v23  ;;  %523 = vst [vmem:[#allocation3 + $0xe] sm:$0x3] %v1336_v26  ;;  %v1334_v31 = vld [vmem:[%s1930_s27 + $0x8] sm:$0x3]  ;;  %v1338_v32 = vld [vmem:[%s1930_s27 + $0x10] sm:$0x3] }
  0xa1   : > { %v499_v33 = vmul.f32 %v496_v24, %v496_v24  ;;  %v514_v34 = vmax.f32 %v1335_v25, 0.001  ;;  %v524_v35 = vsub.f32 1.0, %v1336_v26  ;;  %v533_v36 = vmax.f32 %v1338_v32, 0.001 }
  0xa2   : > { %v469_v37 = vadd.f32 %v468_v28, %v467_v27  ;;  %v507_v38 = vmul.f32 0.31830987, %v506_v30  ;;  %v1339_v39 = vld [vmem:[%s1930_s27 + $0x16] sm:$0x3]  ;;  %v1337_v40 = vld [vmem:[%s1930_s27 + $0xa] sm:$0x3] }
  0xa3   : > { %v500_v41 = vmul.f32 %v499_v33, %v499_v33  ;;  %v515_v42 = vmin.f32 %v514_v34, 1.0  ;;  %v525_v43 = vmul.f32 %v1334_v31, %v524_v35  ;;  %v534_v44 = vmin.f32 %v533_v36, 1.0  ;;  %542 = vst [vmem:[#allocation3 + $0x10] sm:$0x3] %v1339_v39  ;;  %v548_v45 = vld [vmem:[%s1936_s28] sm:$0x3] }
  0xa4   : > { %v471_v46 = vadd.f32 %v470_v29, %v469_v37  ;;  %509 = vst [vmem:[#allocation3 + $0x12] sm:$0x3] %v507_v38  ;;  %v543_v47 = vsub.f32 1.0, %v1339_v39  ;;  %v549_v48 = vmul.f32 2.0, %v548_v45  ;;  %v1341_v49 = vld [vmem:[%s1936_s28 + $0x2] sm:$0x3] }
  0xa5   : > { %502 = vst [vmem:[#allocation3 + $0x6] sm:$0x3] %v500_v41  ;;  %v518_v50 = vmul.f32 %v515_v42, %v515_v42  ;;  %v526_v51 = vmul.f32 0.31830987, %v525_v43  ;;  %v537_v52 = vmul.f32 %v534_v44, %v534_v44  ;;  %v553_v53 = vmul.f32 2.0, %v1341_v49  ;;  %s2042_s27 = smov 0  }
  0xa6   : > { %v2009_v54 = vmax.f32 %v471_v46, 1e-12  ;;  %v544_v55 = vmul.f32 %v1337_v40, %v543_v47  ;;  %v2011_v56 = vadd.f32 -1.0, %v549_v48  ;;  %v1343_v57 = vld [vmem:[%s1936_s28 + $0x4] sm:$0x3]  ;;  %v1763_v41 = vmov 0.0  }
  0xa7   : > { %v519_v58 = vmul.f32 %v518_v50, %v518_v50  ;;  %528 = vst [vmem:[#allocation3 + $0x14] sm:$0x3] %v526_v51  ;;  %v538_v59 = vmul.f32 %v537_v52, %v537_v52  ;;  %v2014_v60 = vadd.f32 -1.0, %v553_v53  ;;  %v557_v61 = vmul.f32 2.0, %v1343_v57  ;;  %v1346_v62 = vld [vmem:[%s1936_s28 + $0xc] sm:$0x3] }
  0xa8   : > { %1494 = vrsqrt.f32 %v2009_v54  ;;  %v545_v63 = vmul.f32 0.31830987, %v544_v55  ;;  %v559_v2 = vmul.f32 %v2011_v56, %v2011_v56  ;;  %v1347_v3 = vld [vmem:[%s1936_s28 + $0x12] sm:$0x3]  ;;  %v1345_v4 = vld [vmem:[%s1936_s28 + $0x6] sm:$0x3]  ;;  %vm479_vm9 = vweird.f32 %v2009_v54 }
  0xa9   : > { %521 = vst [vmem:[#allocation3 + $0x8] sm:$0x3] %v519_v58  ;;  %v2022_v5 = vadd.f32 -1.0, %v557_v61  ;;  %v560_v6 = vmul.f32 %v2014_v60, %v2014_v60  ;;  %v588_v7 = vmax.f32 %v1346_v62, 0.001  ;;  %v598_v8 = vsub.f32 1.0, %v1347_v3 }
  0xaa   : > { %540 = vst [vmem:[#allocation3 + $0xa] sm:$0x3] %v538_v59  ;;  %v1349_v9 = vld [vmem:[%s1936_s28 + $0xe] sm:$0x3]  ;;  %v1350_v10 = vld [vmem:[%s1936_s28 + $0x14] sm:$0x3] }
  0xab   : > { %547 = vst [vmem:[#allocation3 + $0x16] sm:$0x3] %v545_v63  ;;  %v561_v11 = vadd.f32 %v560_v6, %v559_v2  ;;  %v562_v12 = vmul.f32 %v2022_v5, %v2022_v5  ;;  %v589_v13 = vmin.f32 %v588_v7, 1.0  ;;  %v599_v14 = vmul.f32 %v1345_v4, %v598_v8  ;;  %v1348_v15 = vld [vmem:[%s1936_s28 + $0x8] sm:$0x3] }
  0xac   : > { %597 = vst [vmem:[#allocation3 + $0x24] sm:$0x3] %v1347_v3  ;;  %v607_v16 = vmax.f32 %v1349_v9, 0.001  ;;  %v617_v17 = vsub.f32 1.0, %v1350_v10 }
  0xad   : > { %v563_v18 = vadd.f32 %v562_v12, %v561_v11  ;;  %v592_v19 = vmul.f32 %v589_v13, %v589_v13  ;;  %v600_v20 = vmul.f32 0.31830987, %v599_v14  ;;  %616 = vst [vmem:[#allocation3 + $0x26] sm:$0x3] %v1350_v10  ;;  %v1352_v0 = vld [vmem:[%s1936_s28 + $0x10] sm:$0x3] }
  0xae   : > { %v1495_v23 = vpop.eup %1494  ;;  %v608_v24 = vmin.f32 %v607_v16, 1.0  ;;  %v618_v25 = vmul.f32 %v1348_v15, %v617_v17  ;;  %v626_v26 = vmax.f32 %v1352_v0, 0.001  ;;  %v1353_v27 = vld [vmem:[%s1936_s28 + $0x16] sm:$0x3] }
  0xaf   : > { %v474_v28 = vmul.f32 %v1495_v23, %v2009_v54  ;;  %v564_v29 = vmax.f32 %v563_v18, 1e-12  ;;  %v593_v30 = vmul.f32 %v592_v19, %v592_v19  ;;  %602 = vst [vmem:[#allocation3 + $0x2a] sm:$0x3] %v600_v20  ;;  %v1351_v31 = vld [vmem:[%s1936_s28 + $0xa] sm:$0x3]  ;;  %vm480_vm10 = vweird.f32 %v1495_v23 }
  0xb0   : > { %v611_v32 = vmul.f32 %v608_v24, %v608_v24  ;;  %v619_v33 = vmul.f32 0.31830987, %v618_v25  ;;  %v627_v34 = vmin.f32 %v626_v26, 1.0  ;;  %635 = vst [vmem:[#allocation3 + $0x28] sm:$0x3] %v1353_v27  ;;  %v636_v35 = vsub.f32 1.0, %v1353_v27  ;;  %vm481_vm11 = vmor %vm479_vm9, %vm480_vm10 }
  0xb1   : > { %v475_v36 = vmul.f32 %v1495_v23, %v474_v28  ;;  %1496 = vrsqrt.f32 %v564_v29  ;;  %595 = vst [vmem:[#allocation3 + $0x1e] sm:$0x3] %v593_v30  ;;  %vm571_vm12 = vweird.f32 %v564_v29 }
  0xb2   : > { %v612_v37 = vmul.f32 %v611_v32, %v611_v32  ;;  %621 = vst [vmem:[#allocation3 + $0x2c] sm:$0x3] %v619_v33  ;;  %v630_v38 = vmul.f32 %v627_v34, %v627_v34  ;;  %v637_v39 = vmul.f32 %v1351_v31, %v636_v35 }
  0xb3   : > { %v476_v40 = vmul.f32 0.5, %v475_v36  ;;  %641 = vst [vmem:[#allocation4] sm:$0x3] %v1763_v41 }
  0xb4   : > { %614 = vst [vmem:[#allocation3 + $0x20] sm:$0x3] %v612_v37  ;;  %v631_v42 = vmul.f32 %v630_v38, %v630_v38  ;;  %v638_v43 = vmul.f32 0.31830987, %v637_v39 }
  0xb5   : > { %v477_v44 = vsub.f32 1.5, %v476_v40 }
  0xb6   : > { %633 = vst [vmem:[#allocation3 + $0x22] sm:$0x3] %v631_v42 }
  0xb7   : > { %v1497_v45 = vpop.eup %1496  ;;  %v478_v46 = vmul.f32 %v1495_v23, %v477_v44  ;;  %640 = vst [vmem:[#allocation3 + $0x2e] sm:$0x3] %v638_v43 }
  0xb8   : > { %v566_v47 = vmul.f32 %v1497_v45, %v564_v29  ;;  %vm572_vm13 = vweird.f32 %v1497_v45 }
  0xb9   : > { %v482_v48 = vsel %vm481_vm11, %v1495_v23, %v478_v46  ;;  %vm573_vm14 = vmor %vm571_vm12, %vm572_vm13 }
  0xba   : > { %v483_v49 = vmul.f32 %v1989_v1, %v482_v48  ;;  %v485_v50 = vmul.f32 %v1991_v21, %v482_v48  ;;  %v488_v51 = vmul.f32 %v1993_v22, %v482_v48  ;;  %v567_v52 = vmul.f32 %v1497_v45, %v566_v47 }
  0xbc   : > { %484 = vst [vmem:[#allocation3] sm:$0x3] %v483_v49  ;;  %v568_v53 = vmul.f32 0.5, %v567_v52 }
  0xbd   : > { %487 = vst [vmem:[#allocation3 + $0x2] sm:$0x3] %v485_v50 }
  0xbe   : > { %490 = vst [vmem:[#allocation3 + $0x4] sm:$0x3] %v488_v51  ;;  %v569_v54 = vsub.f32 1.5, %v568_v53 }
  0xc0   : > { %v570_v55 = vmul.f32 %v1497_v45, %v569_v54 }
  0xc2   : > { %v574_v57 = vsel %vm573_vm14, %v1497_v45, %v570_v55 }
  0xc3   : > { %v575_v58 = vmul.f32 %v2011_v56, %v574_v57  ;;  %v578_v59 = vmul.f32 %v2014_v60, %v574_v57  ;;  %v581_v1 = vmul.f32 %v2022_v5, %v574_v57 }
  0xc5   : > { %577 = vst [vmem:[#allocation3 + $0x18] sm:$0x3] %v575_v58 }
  0xc6   : > { %580 = vst [vmem:[#allocation3 + $0x1a] sm:$0x3] %v578_v59 }
  0xc7   : > { %583 = vst [vmem:[#allocation3 + $0x1c] sm:$0x3] %v581_v1 }
  0xc8 LB: >> { %s655_s28 = smul.u32 22, %s1757_s27  ;;  %v689_v21 = vld [vmem:[#allocation3] sm:$0x3]  ;;  %v690_v22 = vld [vmem:[#allocation3 + $0x2] sm:$0x3]  ;;  %s1757_s27 = sphi %s2042_s27, %s647_s27  }
  0xc9   : >> { %v691_v56 = vld [vmem:[#allocation3 + $0x4] sm:$0x3]  ;;  %v2056_v14 = vld [vmem:[#allocation3 + $0x6] sm:$0x3]  ;;  %v2067_v32 = vld [vmem:[#allocation3 + $0x1e] sm:$0x3] }
  0xca   : >> { %s2048_s11 = scalar_lea.vmem [#allocation2], %s655_s28  ;;  %v2061_v23 = vadd.f32 -1.0, %v2056_v14  ;;  %v2086_v41 = vadd.f32 -1.0, %v2067_v32  ;;  %v2099_v50 = vld [vmem:[#allocation3 + $0x8] sm:$0x3]  ;;  %s2311_s13 = smul.u32 9, %s1757_s27 }
  0xcb   : >> { %v657_v60 = vld [vmem:[%s2048_s11] sm:$0x3]  ;;  %v1354_v63 = vld [vmem:[%s2048_s11 + $0x2] sm:$0x3]  ;;  %v1355_v3 = vld [vmem:[%s2048_s11 + $0x4] sm:$0x3] }
  0xcc   : >> { %v715_v61 = vld [vmem:[#allocation3 + $0x18] sm:$0x3]  ;;  %v1356_v4 = vld [vmem:[%s2048_s11 + $0x6] sm:$0x3]  ;;  %v1357_v5 = vld [vmem:[%s2048_s11 + $0x8] sm:$0x3]  ;;  %v698_v6 = vmul.f32 %v689_v21, %v657_v60  ;;  %v699_v7 = vmul.f32 %v1354_v63, %v690_v22  ;;  %v701_v10 = vmul.f32 %v1355_v3, %v691_v56 }
  0xcd   : >> { %v716_v62 = vld [vmem:[#allocation3 + $0x1a] sm:$0x3]  ;;  %v724_v8 = vmul.f32 %v715_v61, %v657_v60  ;;  %v1358_v9 = vld [vmem:[%s2048_s11 + $0xa] sm:$0x3]  ;;  %v704_v11 = vmul.f32 %v1356_v4, %v689_v21  ;;  %v705_v12 = vmul.f32 %v1357_v5, %v690_v22  ;;  %v1359_v17 = vld [vmem:[%s2048_s11 + $0xc] sm:$0x3]  ;;  %v730_v26 = vmul.f32 %v1356_v4, %v715_v61 }
  0xce   : >> { %v717_v2 = vld [vmem:[#allocation3 + $0x1c] sm:$0x3]  ;;  %v725_v13 = vmul.f32 %v1354_v63, %v716_v62  ;;  %v700_v15 = vadd.f32 %v699_v7, %v698_v6  ;;  %v707_v16 = vmul.f32 %v1358_v9, %v691_v56  ;;  %v1360_v18 = vld [vmem:[%s2048_s11 + $0xe] sm:$0x3]  ;;  %v731_v27 = vmul.f32 %v1357_v5, %v716_v62  ;;  %v1361_v33 = vld [vmem:[%s2048_s11 + $0x10] sm:$0x3] }
  0xcf   : >> { %v706_v19 = vadd.f32 %v705_v12, %v704_v11  ;;  %v727_v20 = vmul.f32 %v1355_v3, %v717_v2  ;;  %v692_v28 = vmul.f32 %v1359_v17, %v689_v21  ;;  %v693_v29 = vmul.f32 %v1360_v18, %v690_v22  ;;  %v2119_v1 = vld [vmem:[%s2048_s11 + $0x14] sm:$0x3]  ;;  %v743_v5 = vld [vmem:[#allocation3 + $0xc] sm:$0x3]  ;;  %s649_s22 = sadd.s32 6, %s2311_s13  ;;  %s651_s6 = sadd.s32 7, %s2311_s13 }
  0xd0   : >> { %v702_v0 = vadd.f32 %v701_v10, %v700_v15  ;;  %v726_v25 = vadd.f32 %v725_v13, %v724_v8  ;;  %v733_v31 = vmul.f32 %v1358_v9, %v717_v2  ;;  %v732_v36 = vadd.f32 %v731_v27, %v730_v26  ;;  %s2336_s5 = sld [smem:[#allocation5 + %s649_s22]]  ;;  %s653_s14 = sadd.s32 8, %s2311_s13 }
  0xd1   : >> { %v2063_v24 = vadd.f32 %v707_v16, %v706_v19  ;;  %v694_v42 = vadd.f32 %v693_v29, %v692_v28  ;;  %v695_v43 = vmul.f32 %v1361_v33, %v691_v56  ;;  %v718_v44 = vmul.f32 %v1359_v17, %v715_v61  ;;  %s2348_s9 = sld [smem:[#allocation5 + %s651_s6]]  ;;  %s647_s27 = sadd.s32 1, %s1757_s27  }
  0xd2   : >> { %v2065_v30 = vmax.f32 %v702_v0, 0.001  ;;  %v728_v35 = vadd.f32 %v727_v20, %v726_v25  ;;  %v2083_v40 = vadd.f32 %v733_v31, %v732_v36  ;;  %v719_v46 = vmul.f32 %v1360_v18, %v716_v62  ;;  %v2152_v20 = vld [vmem:[#allocation3 + $0x20] sm:$0x3]  ;;  %s2374_s25 = sld [smem:[#allocation5 + %s653_s14]]  ;;  %p644_p9 = scmp.ge.s32.totalorder %s647_s27, 9  }
  0xd3   : >> { %v2071_v34 = vmax.f32 %v2063_v24, 0.001  ;;  %v2115_v55 = vadd.f32 -1.0, %v2099_v50  ;;  %v696_v57 = vadd.f32 %v695_v43, %v694_v42  ;;  %v721_v59 = vmul.f32 %v1361_v33, %v717_v2  ;;  %s1371_s30 = sshll.u32 (%p644_p9), %s1741_s18, 3  ;;  %s1096_s2 = sshll.u32 (%p644_p9), %s1939_s10, 4  ;;  %s1097_s2 = int_to_ptr.vmem [resolvable:$true] %s1096_s2 }
  0xd4   : >> { %v2075_v37 = vmul.f32 %v2065_v30, %v2065_v30  ;;  %v2081_v39 = vmax.f32 %v728_v35, 0.001  ;;  %v2091_v47 = vmax.f32 %v2083_v40, 0.001  ;;  %v720_v58 = vadd.f32 %v719_v46, %v718_v44  ;;  %s1094_s1 = scalar_lea.hbm (%p644_p9), %s2430_s4, %s1371_s30  ;;  %s1082_s12 = scalar_lea.sflag (%p644_p9), [#allocation7], %s1927_s0 }
  0xd5   : >> { %v2079_v38 = vmul.f32 %v2071_v34, %v2071_v34  ;;  %v697_v62 = vmax.f32 %v696_v57, 0.001  ;;  %v2132_v2 = vsub.f32 1.0, %v2119_v1  ;;  %v2161_v33 = vadd.f32 -1.0, %v2152_v20  ;;  %s1098_s21 = sshll.u32 (%p644_p9), %s1094_s1, 4  ;;  %s1671_s13 = scalar_lea.hbm (%p644_p9), %s2430_s4, 16  ;;  %s1099_s21 = int_to_ptr.hbm [resolvable:$true] %s1098_s21 }
  0xd6   : >> { %v749_v45 = vmul.f32 %v2061_v23, %v2075_v37  ;;  %v2095_v48 = vmul.f32 %v2081_v39, %v2081_v39  ;;  %v2106_v52 = vmul.f32 %v2091_v47, %v2091_v47  ;;  %v857_v61 = vmul.f32 %v2115_v55, %v2075_v37  ;;  %s1665_s27 = sshra.s32 (%p644_p9), %s1099_s21, 4  ;;  %s1666_s27 = int_to_ptr.hbm [resolvable:$true] %s1665_s27 }
  0xd7   : >> { %v763_v49 = vmul.f32 %v2061_v23, %v2079_v38  ;;  %v871_v56 = vmul.f32 %v2115_v55, %v2079_v38  ;;  %v722_v60 = vadd.f32 %v721_v59, %v720_v58  ;;  %v2146_v10 = vmul.f32 %v697_v62, %v697_v62  ;;  %s1667_s28 = scalar_lea.hbm (%p644_p9), %s1666_s27, 8  ;;  %p1672_p13 = scmp.lt.s32.totalorder (%p644_p9), %s1666_s27, %s2430_s4 }
  0xd8   : >> { %v2102_v51 = vsub.f32 %v2056_v14, %v749_v45  ;;  %v800_v54 = vmul.f32 %v2086_v41, %v2095_v48  ;;  %v814_v22 = vmul.f32 %v2086_v41, %v2106_v52  ;;  %v2139_v7 = vsub.f32 %v2099_v50, %v857_v61  ;;  %v794_v61 = vld [vmem:[#allocation3 + $0x24] sm:$0x3]  ;;  %p1668_p10 = scmp.ne.s32.totalorder (%p644_p9), %s1666_s27, %s1667_s28  ;;  %p1673_p3 = scmp.lt.s32.totalorder (%p644_p9), %s1671_s13, %s1667_s28 }
  0xd9   : >> { %v2109_v53 = vsub.f32 %v2056_v14, %v763_v49  ;;  %v2142_v8 = vsub.f32 %v2099_v50, %v871_v56  ;;  %v723_v11 = vmax.f32 %v722_v60, 0.001  ;;  %v777_v15 = vmul.f32 %v743_v5, %v2132_v2 }
  0xda   : >> { %1498 = vrsqrt.f32 %v2102_v51  ;;  %v2122_v21 = vsub.f32 %v2067_v32, %v800_v54  ;;  %v2135_v3 = vsub.f32 %v2067_v32, %v814_v22  ;;  %v746_v25 = vmul.f32 %v2061_v23, %v2146_v10  ;;  %p1669_p11 = pnand (%p644_p9), %p1668_p10, %p1877_p0  ;;  %p1674_p5 = por (%p644_p9), %p1673_p3, %p1672_p13 }
  0xdb   : >> { %1500 = vrsqrt.f32 %v2109_v53  ;;  %v2154_v0 = vmul.f32 %v723_v11, %v723_v11  ;;  %v778_v27 = vadd.f32 %v2119_v1, %v777_v15  ;;  %vm758_vm15 = vcmp.eq.f32.partialorder %v2102_v51, inf }
  0xdc   : >> { %1502 = vrsqrt.f32 %v2122_v21  ;;  %v747_v44 = vadd.f32 1.0, %v746_v25  ;;  %vm760_vm0 = vcmp.eq.f32.partialorder %v2102_v51, 0.0  ;;  %v761_v58 = vand.u32 2147483648, %v2102_v51  ;;  %p1670_p12 = pneg (%p644_p9), %p1669_p11 }
  0xdd   : >> { %1504 = vrsqrt.f32 %v2135_v3  ;;  %v797_v45 = vmul.f32 %v2086_v41, %v2154_v0  ;;  %v785_v49 = vmul.f32 %v778_v27, %v2056_v14  ;;  %v908_v22 = vmul.f32 %v2161_v33, %v2095_v48 }
  0xde   : >> { %1506 = vrsqrt.f32 %v2139_v7  ;;  %v748_v5 = vmax.f32 %v747_v44, 0.001  ;;  %vm772_vm1 = vcmp.eq.f32.partialorder %v2109_v53, inf  ;;  %vm774_vm2 = vcmp.eq.f32.partialorder %v2109_v53, 0.0  ;;  %p1675_p1 = pnand (%p644_p9), %p1674_p5, %p1670_p12 }
  0xdf   : >> { %1508 = vrsqrt.f32 %v2142_v8  ;;  %v798_v14 = vadd.f32 1.0, %v797_v45  ;;  %v2189_v15 = vsub.f32 %v2152_v20, %v908_v22  ;;  %vm809_vm3 = vcmp.eq.f32.partialorder %v2122_v21, inf }
  0xe0   : >> { %v1499_v63 = vpop.eup %1498  ;;  %v779_v27 = vmul.f32 %v748_v5, %v748_v5  ;;  %vm811_vm4 = vcmp.eq.f32.partialorder %v2122_v21, 0.0  ;;  %vm823_vm5 = vcmp.eq.f32.partialorder %v2135_v3, inf  ;;  %vm825_vm6 = vcmp.eq.f32.partialorder %v2135_v3, 0.0 }
  0xe1   : >> { %v1501_v4 = vpop.eup %1500  ;;  %v752_v6 = vmul.f32 %v1499_v63, %v2102_v51  ;;  %1510 = vrsqrt.f32 %v2189_v15  ;;  %vm866_vm7 = vcmp.eq.f32.partialorder %v2139_v7, inf  ;;  %vm868_vm8 = vcmp.eq.f32.partialorder %v2139_v7, 0.0 }
  0xe2   : >> { %v766_v9 = vmul.f32 %v1501_v4, %v2109_v53  ;;  %v1503_v16 = vpop.eup %1502  ;;  %vm880_vm9 = vcmp.eq.f32.partialorder %v2142_v8, inf  ;;  %vm882_vm10 = vcmp.eq.f32.partialorder %v2142_v8, 0.0  ;;  %vm917_vm11 = vcmp.eq.f32.partialorder %v2189_v15, inf }
  0xe3   : >> { %v753_v12 = vmul.f32 %v1499_v63, %v752_v6  ;;  %v803_v19 = vmul.f32 %v1503_v16, %v2122_v21  ;;  %v1505_v26 = vpop.eup %1504  ;;  %vm919_vm12 = vcmp.eq.f32.partialorder %v2189_v15, 0.0 }
  0xe4   : >> { %v767_v13 = vmul.f32 %v1501_v4, %v766_v9  ;;  %v817_v31 = vmul.f32 %v1505_v26, %v2135_v3  ;;  %v1507_v35 = vpop.eup %1506  ;;  %v775_v9 = vand.u32 2147483648, %v2109_v53 }
  0xe5   : >> { %v754_v17 = vmul.f32 0.5, %v753_v12  ;;  %v804_v28 = vmul.f32 %v1503_v16, %v803_v19  ;;  %v2163_v43 = vpop.eup %1508  ;;  %v860_v46 = vmul.f32 %v1507_v35, %v2139_v7  ;;  %v2185_v12 = vmul.f32 0.31830987, %v785_v49 }
  0xe6   : >> { %v768_v18 = vmul.f32 0.5, %v767_v13  ;;  %v818_v23 = vmul.f32 %v1505_v26, %v817_v31  ;;  %v874_v54 = vmul.f32 %v2163_v43, %v2142_v8  ;;  %v828_v13 = vmul.f32 %v794_v61, %v2132_v2  ;;  %v851_v61 = vld [vmem:[#allocation3 + $0xe] sm:$0x3] }
  0xe7   : >> { %v755_v29 = vsub.f32 1.5, %v754_v17  ;;  %v805_v42 = vmul.f32 0.5, %v804_v28  ;;  %v861_v59 = vmul.f32 %v1507_v35, %v860_v46  ;;  %v799_v28 = vmax.f32 %v798_v14, 0.001 }
  0xe8   : >> { %v769_v36 = vsub.f32 1.5, %v768_v18  ;;  %v819_v62 = vmul.f32 0.5, %v818_v23  ;;  %v875_v60 = vmul.f32 %v2163_v43, %v874_v54  ;;  %v826_v49 = vand.u32 2147483648, %v2135_v3 }
  0xe9   : >> { %v756_v57 = vmul.f32 %v1499_v63, %v755_v29  ;;  %v806_v56 = vsub.f32 1.5, %v805_v42  ;;  %v862_v6 = vmul.f32 0.5, %v861_v59  ;;  %v922_v63 = vmul.f32 %v2161_v33, %v2106_v52  ;;  %v2213_v59 = vld [vmem:[#allocation3 + $0xa] sm:$0x3] }
  0xea   : >> { %v770_v41 = vmul.f32 %v1501_v4, %v769_v36  ;;  %v854_v4 = vmul.f32 %v2115_v55, %v2146_v10  ;;  %v820_v19 = vsub.f32 1.5, %v819_v62  ;;  %v876_v25 = vmul.f32 0.5, %v875_v60  ;;  %v1511_v62 = vpop.eup %1510 }
  0xeb   : >> { %v757_v11 = vmul.f32 %v756_v57, %v2102_v51  ;;  %v807_v18 = vmul.f32 %v1503_v16, %v806_v56  ;;  %v863_v29 = vsub.f32 1.5, %v862_v6  ;;  %v2193_v31 = vsub.f32 %v2152_v20, %v922_v63 }
  0xec   : >> { %v771_v17 = vmul.f32 %v770_v41, %v2109_v53  ;;  %v855_v55 = vadd.f32 1.0, %v854_v4  ;;  %v812_v16 = vand.u32 2147483648, %v2122_v21  ;;  %v2204_v42 = vadd.f32 %v2119_v1, %v828_v13 }
  0xed   : >> { %v759_v36 = vsel %vm758_vm15, %v2102_v51, %v757_v11  ;;  %v808_v45 = vmul.f32 %v807_v18, %v2122_v21  ;;  %v821_v23 = vmul.f32 %v1505_v26, %v820_v19  ;;  %v877_v46 = vsub.f32 1.5, %v876_v25 }
  0xee   : >> { %v773_v44 = vsel %vm772_vm1, %v2109_v53, %v771_v17  ;;  %v830_v54 = vmul.f32 %v799_v28, %v799_v28  ;;  %v864_v57 = vmul.f32 %v1507_v35, %v863_v29  ;;  %1512 = vrsqrt.f32 %v2193_v31 }
  0xef   : >> { %v762_v22 = vsel %vm760_vm0, %v761_v58, %v759_v36  ;;  %v856_v41 = vmax.f32 %v855_v55, 0.001  ;;  %v776_v26 = vsel %vm774_vm2, %v775_v9, %v773_v44  ;;  %v869_v56 = vand.u32 2147483648, %v2139_v7  ;;  %v902_v44 = vld [vmem:[#allocation3 + $0x26] sm:$0x3] }
  0xf0   : >> { %v905_v35 = vmul.f32 %v2161_v33, %v2154_v0  ;;  %v810_v51 = vsel %vm809_vm3, %v2122_v21, %v808_v45  ;;  %v822_v58 = vmul.f32 %v821_v23, %v2135_v3  ;;  %v878_v60 = vmul.f32 %v2163_v43, %v877_v46 }
  0xf1   : >> { %v1368_v53 = vadd.f32 -1.0, %v2213_v59  ;;  %v780_v5 = vadd.f32 %v762_v22, %v2065_v30  ;;  %v865_v14 = vmul.f32 %v864_v57, %v2139_v7  ;;  %v911_v6 = vmul.f32 %v1511_v62, %v2189_v15 }
  0xf2   : >> { %v883_v33 = vand.u32 2147483648, %v2142_v8  ;;  %v885_v63 = vmul.f32 %v851_v61, %v2132_v2  ;;  %v782_v43 = vadd.f32 %v776_v26, %v2071_v34  ;;  %v813_v13 = vsel %vm811_vm4, %v812_v16, %v810_v51 }
  0xf3   : >> { %v965_v9 = vmul.f32 %v1368_v53, %v2075_v37  ;;  %v979_v4 = vmul.f32 %v1368_v53, %v2079_v38  ;;  %v906_v17 = vadd.f32 1.0, %v905_v35  ;;  %v912_v18 = vmul.f32 %v1511_v62, %v911_v6 }
  0xf4   : >> { %v1513_v11 = vpop.eup %1512  ;;  %v824_v19 = vsel %vm823_vm5, %v2135_v3, %v822_v58  ;;  %v879_v25 = vmul.f32 %v878_v60, %v2142_v8  ;;  %v781_v38 = vmul.f32 %v780_v5, %v779_v27  ;;  %v867_v29 = vsel %vm866_vm7, %v2139_v7, %v865_v14 }
  0xf5   : >> { %v925_v28 = vmul.f32 %v1513_v11, %v2193_v31  ;;  %v2248_v37 = vsub.f32 %v2213_v59, %v965_v9  ;;  %v913_v21 = vmul.f32 0.5, %v912_v18  ;;  %v2254_v55 = vsub.f32 %v2213_v59, %v979_v4 }
  0xf6   : >> { %v831_v36 = vadd.f32 %v813_v13, %v2081_v39  ;;  %v887_v16 = vmul.f32 %v856_v41, %v856_v41  ;;  %v827_v23 = vsel %vm825_vm6, %v826_v49, %v824_v19  ;;  %v886_v27 = vadd.f32 %v2119_v1, %v885_v63  ;;  %v2269_v49 = vld [vmem:[#allocation3 + $0x22] sm:$0x3] }
  0xf7   : >> { %v926_v45 = vmul.f32 %v1513_v11, %v925_v28  ;;  %1514 = vrsqrt.f32 %v2248_v37  ;;  %v907_v46 = vmax.f32 %v906_v17, 0.001  ;;  %v914_v57 = vsub.f32 1.5, %v913_v21 }
  0xf8   : >> { %v870_v22 = vsel %vm868_vm8, %v869_v56, %v867_v29  ;;  %v881_v26 = vsel %vm880_vm9, %v2142_v8, %v879_v25  ;;  %1516 = vrsqrt.f32 %v2254_v55  ;;  %v783_v41 = vmul.f32 %v782_v43, %v781_v38 }
  0xf9   : >> { %v927_v61 = vmul.f32 0.5, %v926_v45  ;;  %v915_v35 = vmul.f32 %v1511_v62, %v914_v57  ;;  %v936_v3 = vmul.f32 %v902_v44, %v2132_v2  ;;  %v832_v51 = vmul.f32 %v831_v36, %v830_v54  ;;  %v959_v57 = vld [vmem:[#allocation3 + $0x10] sm:$0x3] }
  0xfa   : >> { %v920_v7 = vand.u32 2147483648, %v2189_v15  ;;  %v833_v58 = vadd.f32 %v827_v23, %v2091_v47  ;;  %v884_v60 = vsel %vm882_vm10, %v883_v33, %v881_v26  ;;  %v888_v5 = vadd.f32 %v870_v22, %v2065_v30 }
  0xfb   : >> { %v928_v56 = vsub.f32 1.5, %v927_v61  ;;  %v916_v62 = vmul.f32 %v915_v35, %v2189_v15  ;;  %vm931_vm13 = vcmp.eq.f32.partialorder %v2193_v31, inf  ;;  %v962_v54 = vmul.f32 %v1368_v53, %v2146_v10 }
  0xfc   : >> { %v2281_v63 = vadd.f32 -1.0, %v2269_v49  ;;  %v934_v8 = vand.u32 2147483648, %v2193_v31  ;;  %v938_v33 = vmul.f32 %v907_v46, %v907_v46  ;;  %v890_v13 = vadd.f32 %v884_v60, %v2071_v34 }
  0xfd   : >> { %v1515_v14 = vpop.eup %1514  ;;  %v929_v6 = vmul.f32 %v1513_v11, %v928_v56  ;;  %v918_v9 = vsel %vm917_vm11, %v2189_v15, %v916_v62  ;;  %vm933_vm14 = vcmp.eq.f32.partialorder %v2193_v31, 0.0  ;;  %v889_v53 = vmul.f32 %v888_v5, %v887_v16 }
  0xfe   : >> { %v968_v4 = vmul.f32 %v1515_v14, %v2248_v37  ;;  %v1517_v43 = vpop.eup %1516  ;;  %v921_v11 = vsel %vm919_vm12, %v920_v7, %v918_v9  ;;  %v834_v25 = vmul.f32 %v833_v58, %v832_v51  ;;  %v963_v38 = vadd.f32 1.0, %v962_v54 }
  0xff   : >> { %v930_v10 = vmul.f32 %v929_v6, %v2193_v31  ;;  %v939_v17 = vadd.f32 %v921_v11, %v2081_v39  ;;  %v982_v19 = vmul.f32 %v1517_v43, %v2254_v55  ;;  %v1016_v15 = vmul.f32 %v2281_v63, %v2095_v48 }
 0x100   : >> { %v969_v18 = vmul.f32 %v1515_v14, %v968_v4  ;;  %1518 = vrcp.f32 %v783_v41  ;;  %v836_v16 = vmul.f32 %v2204_v42, %v2067_v32  ;;  %v893_v45 = vmul.f32 %v886_v27, %v2099_v50 }
 0x101   : >> { %v932_v28 = vsel %vm931_vm13, %v2193_v31, %v930_v10  ;;  %v940_v21 = vmul.f32 %v939_v17, %v938_v33  ;;  %v983_v44 = vmul.f32 %v1517_v43, %v982_v19  ;;  %v891_v46 = vmul.f32 %v890_v13, %v889_v53  ;;  %v744_v13 = vld [vmem:[#allocation3 + $0x12] sm:$0x3] }
 0x102   : >> { %v935_v29 = vsel %vm933_vm14, %v934_v8, %v932_v28  ;;  %v970_v36 = vmul.f32 0.5, %v969_v18  ;;  %v2305_v26 = vsub.f32 %v2269_v49, %v1016_v15  ;;  %1520 = vrcp.f32 %v834_v25 }
 0x103   : >> { %v941_v23 = vadd.f32 %v935_v29, %v2091_v47  ;;  %v984_v22 = vmul.f32 0.5, %v983_v44  ;;  %v937_v48 = vadd.f32 %v2119_v1, %v936_v3  ;;  %v964_v61 = vmax.f32 %v963_v38, 0.001 }
 0x104   : >> { %v971_v31 = vsub.f32 1.5, %v970_v36  ;;  %v1030_v41 = vmul.f32 %v2281_v63, %v2106_v52  ;;  %1522 = vrsqrt.f32 %v2305_v26  ;;  %vm974_vm15 = vcmp.eq.f32.partialorder %v2248_v37, inf }
 0x105   : >> { %v942_v32 = vmul.f32 %v941_v23, %v940_v21  ;;  %v985_v42 = vsub.f32 1.5, %v984_v22  ;;  %v977_v27 = vand.u32 2147483648, %v2248_v37  ;;  %v993_v35 = vmul.f32 %v959_v57, %v2132_v2 }
 0x106   : >> { %v972_v50 = vmul.f32 %v1515_v14, %v971_v31  ;;  %v2318_v3 = vsub.f32 %v2269_v49, %v1030_v41  ;;  %1524 = vrcp.f32 %v891_v46  ;;  %vm976_vm0 = vcmp.eq.f32.partialorder %v2248_v37, 0.0  ;;  %v1519_v7 = vpop.eup %1518  ;;  %v852_v46 = vld [vmem:[#allocation3 + $0x14] sm:$0x3] }
 0x107   : >> { %v986_v51 = vmul.f32 %v1517_v43, %v985_v42  ;;  %vm988_vm1 = vcmp.eq.f32.partialorder %v2254_v55, inf  ;;  %vm990_vm2 = vcmp.eq.f32.partialorder %v2254_v55, 0.0  ;;  %v991_v56 = vand.u32 2147483648, %v2254_v55 }
 0x108   : >> { %v973_v52 = vmul.f32 %v972_v50, %v2248_v37  ;;  %1526 = vrsqrt.f32 %v2318_v3  ;;  %v995_v5 = vmul.f32 %v964_v61, %v964_v61  ;;  %v1521_v62 = vpop.eup %1520  ;;  %v837_v14 = vmul.f32 0.31830987, %v836_v16  ;;  %v1010_v50 = vld [vmem:[#allocation3 + $0x28] sm:$0x3] }
 0x109   : >> { %1528 = vrcp.f32 %v942_v32  ;;  %v987_v60 = vmul.f32 %v986_v51, %v2254_v55  ;;  %v944_v6 = vmul.f32 %v937_v48, %v2152_v20  ;;  %v710_v8 = vmax.f32 %v2063_v24, 0.0  ;;  %v903_v48 = vld [vmem:[#allocation3 + $0x2c] sm:$0x3] }
 0x10a   : >> { %v975_v58 = vsel %vm974_vm15, %v2248_v37, %v973_v52  ;;  %v1523_v9 = vpop.eup %1522  ;;  %v787_v33 = vmul.f32 %v1519_v7, %v2185_v12  ;;  %v1362_v37 = vld [vmem:[%s2048_s11 + $0x12] sm:$0x3]  ;;  %v994_v11 = vadd.f32 %v2119_v1, %v993_v35  ;;  %v1013_v24 = vmul.f32 %v2281_v63, %v2154_v0  ;;  %v795_v0 = vld [vmem:[#allocation3 + $0x2a] sm:$0x3] }
 0x10b   : >> { %v978_v54 = vsel %vm976_vm0, %v977_v27, %v975_v58  ;;  %v989_v4 = vsel %vm988_vm1, %v2254_v55, %v987_v60  ;;  %v1019_v12 = vmul.f32 %v1523_v9, %v2305_v26  ;;  %v894_v53 = vmul.f32 0.31830987, %v893_v45 }
 0x10c   : >> { %v996_v43 = vadd.f32 %v978_v54, %v2065_v30  ;;  %v992_v20 = vsel %vm990_vm2, %v991_v56, %v989_v4  ;;  %v1525_v10 = vpop.eup %1524  ;;  %v736_v19 = vmax.f32 %v2083_v40, 0.0  ;;  %v838_v25 = vmul.f32 %v1521_v62, %v837_v14 }
 0x10d   : >> { %v998_v30 = vadd.f32 %v992_v20, %v2071_v34  ;;  %v945_v28 = vmul.f32 0.31830987, %v944_v6  ;;  %v1020_v38 = vmul.f32 %v1523_v9, %v1019_v12  ;;  %v2350_v15 = vmul.f32 %v1362_v37, %v710_v8 }
 0x10e   : >> { %v997_v17 = vmul.f32 %v996_v43, %v995_v5  ;;  %v1527_v18 = vpop.eup %1526  ;;  %v788_v29 = vadd.f32 %v787_v33, %v744_v13  ;;  %v1001_v36 = vmul.f32 %v994_v11, %v2213_v59  ;;  %v1014_v34 = vadd.f32 1.0, %v1013_v24 }
 0x10f   : >> { %v1529_v55 = vpop.eup %1528  ;;  %v1033_v21 = vmul.f32 %v1527_v18, %v2318_v3  ;;  %v1021_v44 = vmul.f32 0.5, %v1020_v38  ;;  %v895_v16 = vmul.f32 %v1525_v10, %v894_v53  ;;  %v2354_v45 = vmul.f32 %v1362_v37, %v736_v19 }
 0x110   : >> { %v999_v63 = vmul.f32 %v998_v30, %v997_v17  ;;  %v839_v23 = vadd.f32 %v838_v25, %v795_v0  ;;  %v946_v57 = vmul.f32 %v1529_v55, %v945_v28  ;;  %v789_v22 = vmul.f32 %v788_v29, %v2350_v15 }
 0x111   : >> { %v1034_v40 = vmul.f32 %v1527_v18, %v1033_v21  ;;  %v1022_v31 = vsub.f32 1.5, %v1021_v44  ;;  %v790_v41 = vstv %s2336_s5  ;;  %v1002_v32 = vmul.f32 0.31830987, %v1001_v36 }
 0x112   : >> { %1530 = vrcp.f32 %v999_v63  ;;  %v1015_v59 = vmax.f32 %v1014_v34, 0.001  ;;  %v896_v27 = vadd.f32 %v895_v16, %v852_v46  ;;  %vm1025_vm3 = vcmp.eq.f32.partialorder %v2305_v26, inf  ;;  %v1011_v63 = vld [vmem:[#allocation3 + $0x2e] sm:$0x3] }
 0x113   : >> { %v1035_v61 = vmul.f32 0.5, %v1034_v40  ;;  %v1023_v42 = vmul.f32 %v1523_v9, %v1022_v31  ;;  %v1028_v35 = vand.u32 2147483648, %v2305_v26  ;;  %v840_v51 = vmul.f32 %v839_v23, %v2354_v45 }
 0x114   : >> { %v947_v7 = vadd.f32 %v946_v57, %v903_v48  ;;  %vm1027_vm4 = vcmp.eq.f32.partialorder %v2305_v26, 0.0  ;;  %v791_v60 = vmul.f32 %v790_v41, %v789_v22  ;;  %v898_v5 = vstv %s2348_s9 }
 0x115   : >> { %v1036_v52 = vsub.f32 1.5, %v1035_v61  ;;  %v1024_v56 = vmul.f32 %v1023_v42, %v2305_v26  ;;  %v1044_v14 = vmul.f32 %v1010_v50, %v2132_v2  ;;  %vm1039_vm5 = vcmp.eq.f32.partialorder %v2318_v3, inf  ;;  %v741_v50 = vld [vmem:[#allocation4] sm:$0x3] }
 0x116   : >> { %v1042_v54 = vand.u32 2147483648, %v2318_v3  ;;  %v1046_v9 = vmul.f32 %v1015_v59, %v1015_v59  ;;  %v897_v8 = vmul.f32 %v896_v27, %v2350_v15  ;;  %vm1041_vm6 = vcmp.eq.f32.partialorder %v2318_v3, 0.0 }
 0x117   : >> { %v1037_v62 = vmul.f32 %v1527_v18, %v1036_v52  ;;  %v1026_v6 = vsel %vm1025_vm3, %v2305_v26, %v1024_v56  ;;  %v841_v43 = vmul.f32 %v840_v51, %v790_v41  ;;  %v948_v37 = vmul.f32 %v947_v7, %v2354_v45  ;;  %v960_v26 = vld [vmem:[#allocation3 + $0x16] sm:$0x3] }
 0x118   : >> { %v1531_v58 = vpop.eup %1530  ;;  %v1029_v33 = vsel %vm1027_vm4, %v1028_v35, %v1026_v6  ;;  %v792_v11 = vadd.f32 0.1, %v791_v60  ;;  %v1045_v12 = vadd.f32 %v2119_v1, %v1044_v14  ;;  %v899_v53 = vmul.f32 %v898_v5, %v897_v8 }
 0x119   : >> { %v1038_v4 = vmul.f32 %v1037_v62, %v2318_v3  ;;  %v1003_v13 = vmul.f32 %v1531_v58, %v1002_v32  ;;  %v1047_v2 = vadd.f32 %v1029_v33, %v2081_v39  ;;  %v842_v30 = vadd.f32 0.1, %v841_v43 }
 0x11a   : >> { %v949_v18 = vmul.f32 %v948_v37, %v898_v5  ;;  %1532 = vlog2.f32 %v792_v11  ;;  %v1052_v39 = vmul.f32 %v1045_v12, %v2269_v49  ;;  %v900_v28 = vadd.f32 0.1, %v899_v53 }
 0x11b   : >> { %v1040_v20 = vsel %vm1039_vm5, %v2318_v3, %v1038_v4  ;;  %v1048_v10 = vmul.f32 %v1047_v2, %v1046_v9  ;;  %v1004_v19 = vadd.f32 %v1003_v13, %v960_v26  ;;  %v1006_v55 = vstv %s2374_s25 }
 0x11c   : >> { %v1043_v24 = vsel %vm1041_vm6, %v1042_v54, %v1040_v20  ;;  %v950_v3 = vadd.f32 0.1, %v949_v18  ;;  %v1053_v29 = vmul.f32 0.31830987, %v1052_v39  ;;  %vm1068_vm7 = vcmask (%p644_p9), 1041408  }
 0x11d   : >> { %v1049_v17 = vadd.f32 %v1043_v24, %v2091_v47  ;;  %v1005_v38 = vmul.f32 %v1004_v19, %v2350_v15 }
 0x11f   : >> { %v1050_v25 = vmul.f32 %v1049_v17, %v1048_v10  ;;  %v1007_v0 = vmul.f32 %v1006_v55, %v1005_v38 }
 0x120   : >> { %v1533_v1 = vpop.eup %1532 }
 0x121   : >> { %1534 = vrcp.f32 %v1050_v25  ;;  %v1008_v34 = vadd.f32 0.1, %v1007_v0  ;;  %v844_v49 = vmul.f32 0.6931472, %v1533_v1 }
 0x122   : >> { %1536 = vlog2.f32 %v842_v30 }
 0x123   : >> { %1538 = vlog2.f32 %v900_v28 }
 0x124   : >> { %1540 = vlog2.f32 %v950_v3 }
 0x125   : >> { %1542 = vlog2.f32 %v1008_v34 }
 0x127   : >> { %v1535_v47 = vpop.eup %1534 }
 0x128   : >> { %v1537_v21 = vpop.eup %1536  ;;  %v1054_v36 = vmul.f32 %v1535_v47, %v1053_v29 }
 0x129   : >> { %v1539_v16 = vpop.eup %1538  ;;  %v846_v40 = vmul.f32 0.6931472, %v1537_v21 }
 0x12a   : >> { %v1055_v44 = vadd.f32 %v1054_v36, %v1011_v63  ;;  %v1541_v23 = vpop.eup %1540  ;;  %v952_v31 = vmul.f32 0.6931472, %v1539_v16 }
 0x12b   : >> { %v847_v15 = vsub.f32 %v844_v49, %v846_v40  ;;  %v954_v22 = vmul.f32 0.6931472, %v1541_v23  ;;  %v1543_v32 = vpop.eup %1542 }
 0x12c   : >> { %v1056_v46 = vmul.f32 %v1055_v44, %v2354_v45  ;;  %v1060_v27 = vmul.f32 0.6931472, %v1543_v32 }
 0x12d   : >> { %v848_v61 = vand.u32 2147483647, %v847_v15  ;;  %v955_v41 = vsub.f32 %v952_v31, %v954_v22 }
 0x12e   : >> { %v1057_v57 = vmul.f32 %v1056_v46, %v1006_v55 }
 0x12f   : >> { %v849_v59 = vadd.f32 %v848_v61, %v741_v50  ;;  %v956_v42 = vand.u32 2147483647, %v955_v41 }
 0x130   : >> { %v1058_v48 = vadd.f32 0.1, %v1057_v57 }
 0x131   : >> { %v957_v51 = vadd.f32 %v956_v42, %v849_v59 }
 0x132   : >> { %1544 = vlog2.f32 %v1058_v48 }
 0x138   : >> { %v1545_v35 = vpop.eup %1544 }
 0x139   : >> { %v1062_v52 = vmul.f32 0.6931472, %v1545_v35 }
 0x13b   : >> { %v1063_v7 = vsub.f32 %v1060_v27, %v1062_v52 }
 0x13d   : >> { %v1064_v56 = vand.u32 2147483647, %v1063_v7  ;;  %646 = sbr.rel (!%p644_p9) target bundleno = 200 (0xc8), region = 200 }
 0x13f   : >> { %v1065_v45 = vadd.f32 %v1064_v56, %v957_v51 }
 0x141   : >> { %1066 = vst [vmem:[#allocation4] sm:$0x3] %v1065_v45 }
 0x148   : > { %v1067_v58 = vld [vmem:[#allocation4] sm:$0x3] }
 0x149   : > { %v1069_v60 = vsel %vm1068_vm7, %v1067_v58, 0.0 }
 0x14a   : > { %1070 = vadd.xlane.f32.xlu0 %v1069_v60 }
 0x1bd   : > { %v1071_v5 = vpop.xlane.xlu0 %1070 }
 0x1be   : > { %v1072_v62 = vrot.slane %v1071_v5, 4 }
 0x1c0   : > { %v1073_v14 = vadd.f32 %v1072_v62, %v1071_v5 }
 0x1c2   : > { %v1074_v6 = vrot.slane %v1073_v14, 2 }
 0x1c4   : > { %v1075_v54 = vadd.f32 %v1074_v6, %v1073_v14 }
 0x1c6   : > { %v1076_v9 = vrot.slane %v1075_v54, 1 }
 0x1c8   : > { %v1077_v8 = vadd.f32 %v1076_v9, %v1075_v54 }
 0x1ca   : > { %1379 = vpush %v1077_v8 }
 0x1fb   : > { %s1380_s29 = spop %1379 }
 0x1fc   : > { %v1079_v33 = vstv %s1380_s29 }
 0x1fd   : > { %1080 = vst [vmem:[%s1939_s10] sm:$0xff] %v1079_v33 }
 0x1fe   : > { %1678 = shalt.err (!%p1675_p1)
}
 0x1ff   : > { %1393 = dma.vmem_to_hbm [thread:$0]  (%p1877_p0), %s1097_s2, 128, %s1099_s21, %s1082_s12  }
 0x200 PF: > { %s1110_s0 = sand.u32 1, %s1729_s15   ;;  %p1410_p6 = pnand %p1308_p4, %p1881_p2 }
 0x201   : > { %s1111_s10 = scalar_lea.sflag [#allocation7], %s1110_s0 }
 0x202   : > { %p1411_p7 = pneg %p1410_p6 }
 0x204   : > { %1724 = dma.done.wait (%p1411_p7), %s1111_s10, 128  }
 0x205   : > { %1726 = vsyncadd (%p1411_p7), %s1111_s10, 4294967168  ;;  %s22_s20 = sadd.s32 1, %s1749_s20   ;;  %s2450_s23 = sld [smem:[#allocation18_spill]] }
 0x206   : > { %p19_p8 = scmp.ge.s32.totalorder %s22_s20, 4   ;;  %s2451_s15 = smov %s1733_s16 }
 0x207   : > { %s2452_s16 = smov %s1737_s17  ;;  %s2453_s17 = smov %s1836_s26 }
 0x208   : > { %s2454_s18 = smov %s1745_s19  ;;  %21 = sbr.rel (!%p19_p8) target bundleno = 12 (0xc), region = 211 }
 0x20b   : > { %s2455_s19 = smov %s2450_s23 }
 0x20d   :  { %1117 = vsyncpa [#allocation6], 1 }
 0x20e   :  { %1119 = vsyncpa [#allocation6 + $0x1], 1 }
 0x20f   :  { %1120 = vsyncpa [#allocation11], 1 }
 0x210   :  { %1122 = vsyncpa [#allocation11 + $0x1], 1 }
 0x211   :  { %1123 = vsyncpa [#allocation7], 1 }
 0x212   :  { %1125 = vsyncpa [#allocation7 + $0x1], 1 }
 0x213   :  { %1126 = vsyncpa [#allocation8], 1 }
 0x214   :  { %1128 = vsyncpa [#allocation8 + $0x1], 1 }

</bundles_post_ra>
